<compile_context>
chip_gen: v5e
topology: v5e:2x2
jax: 0.10.0
libtpu: 0.0.40
codegen_flags: <defaults>
</compile_context>

<pallas_src>
import functools

import jax
import jax.numpy as jnp
from jax.experimental import pallas as pl
from jax.experimental.pallas import tpu as pltpu

HIDDEN = 512
LANE = 128
SUBLANE = 8


def _round_up(n, m):
    return ((n + m - 1) // m) * m


# ----------------------------------------------------------------------------
# Kernel
# ----------------------------------------------------------------------------
def _mlp_kernel(x_ref,
                w1_ref, b1_ref,
                w2_ref, b2_ref,
                w3_ref, b3_ref,
                w4_ref, b4_ref,
                o_ref, *, n_sub, sub_rows):
    # Process n_sub independent row sub-tiles. Because the sub-tiles share no
    # data, the scheduler can issue sub-tile s+1's matmul while sub-tile s is
    # still in its bias/ReLU/cast epilogue, keeping the MXU fed.
    for s in range(n_sub):
        rows = slice(s * sub_rows, (s + 1) * sub_rows)

        # bf16 operands into the MXU, f32 accumulation; elementwise in f32
        # (portable to v5e, which has no bf16 VPU).
        h = jnp.dot(x_ref[rows, :].astype(jnp.bfloat16), w1_ref[...],
                    preferred_element_type=jnp.float32) + b1_ref[...]
        h = jnp.maximum(h, 0.0)

        h = jnp.dot(h.astype(jnp.bfloat16), w2_ref[...],
                    preferred_element_type=jnp.float32) + b2_ref[...]
        h = jnp.maximum(h, 0.0)

        h = jnp.dot(h.astype(jnp.bfloat16), w3_ref[...],
                    preferred_element_type=jnp.float32) + b3_ref[...]
        h = jnp.maximum(h, 0.0)

        y = jnp.dot(h.astype(jnp.bfloat16), w4_ref[...],
                    preferred_element_type=jnp.float32) + b4_ref[...]

        # Softsign: y / (1 + |y|); approx reciprocal runs on the EUP slot.
        o_ref[rows, :] = (y * pl.reciprocal(1.0 + jnp.abs(y),
                                            approx=True)).astype(o_ref.dtype)


def _resident_spec(shape):
    """BlockSpec for a grid-invariant (weight/bias) block.

    The index map is constant, so Pallas does not re-DMA the block between
    grid steps; Buffered(1) additionally drops the second (unused) buffer.
    """
    try:
        return pl.BlockSpec(shape, lambda i: (0, 0),
                            pipeline_mode=pl.Buffered(1))
    except (TypeError, AttributeError):
        # Older jax without pipeline_mode / Buffered: default double-buffering
        # (constant index map still avoids redundant DMAs).
        return pl.BlockSpec(shape, lambda i: (0, 0))


# ----------------------------------------------------------------------------
# Wrapper
# ----------------------------------------------------------------------------
def _choose_tiles(n_rows, tm_max):
    """Pick (tm, n_padded_rows, n_sub).

    - tm <= tm_max (sweep 512/1024/2048 for large batches).
    - tm is capped at ~half the (8-rounded) row count so the parallel grid
      axis has >= 2 steps -> both v7x TensorCores get work, and tiny batches
      are not padded up to a huge tile.
    - n_sub = 2 in-kernel sub-tiles when the tile is large enough to split.
    """
    rows8 = _round_up(max(n_rows, 1), SUBLANE)
    half = _round_up((rows8 + 1) // 2, SUBLANE)
    tm = max(SUBLANE, min(tm_max, half))
    n_padded = _round_up(rows8, tm)
    n_sub = 2 if (tm >= 2 * SUBLANE and tm % (2 * SUBLANE) == 0) else 1
    return tm, n_padded, n_sub


@functools.partial(jax.jit, static_argnames=("tm", "n_sub"))
def _forward_impl(x2d, w1, b1, w2, b2, w3, b3, w4, b4, *, tm, n_sub):
    n_padded, in_pad = x2d.shape
    out_pad = w4.shape[1]
    kernel = functools.partial(_mlp_kernel, n_sub=n_sub, sub_rows=tm // n_sub)

    return pl.pallas_call(
        kernel,
        out_shape=jax.ShapeDtypeStruct((n_padded, out_pad), jnp.float32),
        grid_spec=pltpu.PrefetchScalarGridSpec(
            num_scalar_prefetch=0,
            grid=(n_padded // tm,),
            in_specs=[
                pl.BlockSpec((tm, in_pad), lambda i: (i, 0)),   # x rows
                _resident_spec((in_pad, HIDDEN)),               # w1
                _resident_spec((1, HIDDEN)),                    # b1
                _resident_spec((HIDDEN, HIDDEN)),               # w2
                _resident_spec((1, HIDDEN)),                    # b2
                _resident_spec((HIDDEN, HIDDEN)),               # w3
                _resident_spec((1, HIDDEN)),                    # b3
                _resident_spec((HIDDEN, out_pad)),              # w4 (padded)
                _resident_spec((1, out_pad)),                   # b4 (padded)
            ],
            out_specs=pl.BlockSpec((tm, out_pad), lambda i: (i, 0)),
        ),
        compiler_params=pltpu.CompilerParams(
            dimension_semantics=("parallel",),
            # ~1.3 MiB resident bf16 weights + double-buffered x/out tiles +
            # a few (tm, 512) f32 intermediates stay well under 32 MiB even
            # at tm=1024; 32 MiB is within v7x's 64 MiB physical VMEM.
            vmem_limit_bytes=32 * 1024 * 1024,
        ),
    )(x2d, w1, b1, w2, b2, w3, b3, w4, b4)


def prepare_linear_link_params(params):
    """One-time (outside jit) weight prep: bf16 cast + lane padding.

    - w1 K-dim padded to a multiple of 128 (zeros).
    - w4 / b4 output columns padded to a multiple of 128 (zeros) so the
      kernel's output block is lane-dense; real columns are sliced post-call.
    """
    in_channels = params["w1"].shape[0]
    out_channels = params["w4"].shape[1]
    in_pad = _round_up(in_channels, LANE)
    out_pad = _round_up(out_channels, LANE)

    w1 = jnp.zeros((in_pad, HIDDEN), jnp.bfloat16)
    w1 = w1.at[:in_channels, :].set(params["w1"].astype(jnp.bfloat16))
    w2 = params["w2"].astype(jnp.bfloat16)
    w3 = params["w3"].astype(jnp.bfloat16)
    w4 = jnp.zeros((HIDDEN, out_pad), jnp.bfloat16)
    w4 = w4.at[:, :out_channels].set(params["w4"].astype(jnp.bfloat16))

    b1 = params["b1"].reshape(1, HIDDEN).astype(jnp.float32)
    b2 = params["b2"].reshape(1, HIDDEN).astype(jnp.float32)
    b3 = params["b3"].reshape(1, HIDDEN).astype(jnp.float32)
    b4 = jnp.zeros((1, out_pad), jnp.float32)
    b4 = b4.at[:, :out_channels].set(
        params["b4"].reshape(1, -1).astype(jnp.float32))

    return {
        "w1": w1, "b1": b1, "w2": w2, "b2": b2,
        "w3": w3, "b3": b3, "w4": w4, "b4": b4,
        "in_channels": in_channels, "out_channels": out_channels,
    }


def linear_link_forward(x, prepared, *, tm_max=1024):
    """x: (..., in_channels). prepared: output of prepare_linear_link_params."""
    in_channels = prepared["in_channels"]
    out_channels = prepared["out_channels"]
    in_pad = prepared["w1"].shape[0]

    lead_shape = x.shape[:-1]
    x2d = x.reshape(-1, in_channels).astype(jnp.float32)
    n_rows = x2d.shape[0]

    tm, n_padded, n_sub = _choose_tiles(n_rows, tm_max)

    row_pad = n_padded - n_rows
    feat_pad = in_pad - in_channels
    if row_pad or feat_pad:
        # Row padding is bounded by tm (adaptive), feature padding is tiny.
        x2d = jnp.pad(x2d, ((0, row_pad), (0, feat_pad)))

    out2d = _forward_impl(
        x2d,
        prepared["w1"], prepared["b1"],
        prepared["w2"], prepared["b2"],
        prepared["w3"], prepared["b3"],
        prepared["w4"], prepared["b4"],
        tm=tm, n_sub=n_sub)

    return out2d[:n_rows, :out_channels].reshape(*lead_shape, out_channels)


# ----------------------------------------------------------------------------
# Params / reference / test
# ----------------------------------------------------------------------------
def init_linear_link_params(key, in_channels, out_channels):
    """Deterministic init matching nn.Linear default bounds.

    Weights stored as (fan_in, fan_out) so the kernel computes x @ W + b,
    equivalent to PyTorch's x @ W_torch.T + b.
    """
    dims = [(in_channels, HIDDEN), (HIDDEN, HIDDEN), (HIDDEN, HIDDEN),
            (HIDDEN, out_channels)]
    params = {}
    for idx, (fan_in, fan_out) in enumerate(dims, start=1):
        key, kw, kb = jax.random.split(key, 3)
        bound = 1.0 / jnp.sqrt(fan_in)
        params[f"w{idx}"] = jax.random.uniform(
            kw, (fan_in, fan_out), jnp.float32, -bound, bound)
        params[f"b{idx}"] = jax.random.uniform(
            kb, (fan_out,), jnp.float32, -bound, bound)
    return params


def _reference_forward(x2d, params):
    """Pure-JAX reference mirroring the kernel's bf16-operand / f32-accum math."""
    def mm(a, w):
        return jnp.dot(a.astype(jnp.bfloat16), w.astype(jnp.bfloat16),
                       preferred_element_type=jnp.float32)
    h = jnp.maximum(mm(x2d, params["w1"]) + params["b1"], 0.0)
    h = jnp.maximum(mm(h, params["w2"]) + params["b2"], 0.0)
    h = jnp.maximum(mm(h, params["w3"]) + params["b3"], 0.0)
    y = mm(h, params["w4"]) + params["b4"]
    return y / (1.0 + jnp.abs(y))


if __name__ == "__main__":
    key = jax.random.PRNGKey(0)
    k_param, k_x = jax.random.split(key)

    batch, seq, in_channels, out_channels = 2, 8, 32, 16
    params = init_linear_link_params(k_param, in_channels, out_channels)
    prepared = prepare_linear_link_params(params)   # bf16 cast + padding, once
    x = jax.random.normal(k_x, (batch, seq, in_channels), jnp.float32)

    y = linear_link_forward(x, prepared)
    y = jax.block_until_ready(y)

    # Sanity check against a pure-JAX reference with matching matmul precision
    # (kernel additionally uses the EUP approx reciprocal in the softsign).
    y_ref = _reference_forward(x.reshape(-1, in_channels), params).reshape(
        batch, seq, out_channels)
    assert y.shape == (batch, seq, out_channels)
    max_err = float(jnp.max(jnp.abs(y - y_ref)))
    assert jnp.allclose(y, y_ref, atol=3e-3, rtol=3e-3), max_err

    print("KERNEL_OK")
</pallas_src>

<mosaic_0001>
module attributes {stable_mosaic.version = 11 : i64} {
  func.func @_mlp_kernel(%arg0: i32, %arg1: memref<8x128xf32, #tpu.memory_space<vmem>>, %arg2: memref<128x512xbf16, #tpu.memory_space<vmem>>, %arg3: memref<1x512xf32, #tpu.memory_space<vmem>>, %arg4: memref<512x512xbf16, #tpu.memory_space<vmem>>, %arg5: memref<1x512xf32, #tpu.memory_space<vmem>>, %arg6: memref<512x512xbf16, #tpu.memory_space<vmem>>, %arg7: memref<1x512xf32, #tpu.memory_space<vmem>>, %arg8: memref<512x128xbf16, #tpu.memory_space<vmem>>, %arg9: memref<1x128xf32, #tpu.memory_space<vmem>>, %arg10: memref<8x128xf32, #tpu.memory_space<vmem>>) attributes {dimension_semantics = [#tpu.dimension_semantics<parallel>], iteration_bounds = array<i64: 2>, scalar_prefetch = 0 : i64, scratch_operands = 0 : i64, tpu.core_type = #tpu.core_type<tc>, window_params = [{transform_indices = @transform_0, window_bounds = array<i64: 8, 128>}, {pipeline_mode = #tpu.pipeline_mode<synchronous>, transform_indices = @transform_1, window_bounds = array<i64: 128, 512>}, {pipeline_mode = #tpu.pipeline_mode<synchronous>, transform_indices = @transform_2, window_bounds = array<i64: 1, 512>}, {pipeline_mode = #tpu.pipeline_mode<synchronous>, transform_indices = @transform_3, window_bounds = array<i64: 512, 512>}, {pipeline_mode = #tpu.pipeline_mode<synchronous>, transform_indices = @transform_4, window_bounds = array<i64: 1, 512>}, {pipeline_mode = #tpu.pipeline_mode<synchronous>, transform_indices = @transform_5, window_bounds = array<i64: 512, 512>}, {pipeline_mode = #tpu.pipeline_mode<synchronous>, transform_indices = @transform_6, window_bounds = array<i64: 1, 512>}, {pipeline_mode = #tpu.pipeline_mode<synchronous>, transform_indices = @transform_7, window_bounds = array<i64: 512, 128>}, {pipeline_mode = #tpu.pipeline_mode<synchronous>, transform_indices = @transform_8, window_bounds = array<i64: 1, 128>}, {transform_indices = @transform_9, window_bounds = array<i64: 8, 128>}]} {
    %c0 = arith.constant 0 : index
    %c0_0 = arith.constant 0 : index
    %0 = vector.load %arg1[%c0, %c0_0] : memref<8x128xf32, #tpu.memory_space<vmem>>, vector<8x128xf32>
    %1 = arith.truncf %0 : vector<8x128xf32> to vector<8x128xbf16>
    %c0_1 = arith.constant 0 : index
    %c0_2 = arith.constant 0 : index
    %2 = vector.load %arg2[%c0_1, %c0_2] : memref<128x512xbf16, #tpu.memory_space<vmem>>, vector<128x512xbf16>
    %cst = arith.constant dense<0.000000e+00> : vector<8x512xf32>
    %3 = tpu.matmul %1, %2, %cst {dimension_numbers = #tpu.dot_dimension_numbers<[1], [0], [0], [1], [0, 0, 1, 1], [], []>} : vector<8x128xbf16>, vector<128x512xbf16>, vector<8x512xf32> -> vector<8x512xf32>
    %c0_3 = arith.constant 0 : index
    %c0_4 = arith.constant 0 : index
    %4 = vector.load %arg3[%c0_3, %c0_4] : memref<1x512xf32, #tpu.memory_space<vmem>>, vector<1x512xf32>
    %5 = vector.broadcast %4 : vector<1x512xf32> to vector<8x512xf32>
    %6 = arith.addf %3, %5 : vector<8x512xf32>
    %cst_5 = arith.constant 0.000000e+00 : f32
    %7 = vector.broadcast %cst_5 : f32 to vector<8x512xf32>
    %8 = arith.maximumf %6, %7 : vector<8x512xf32>
    %9 = arith.truncf %8 : vector<8x512xf32> to vector<8x512xbf16>
    %c0_6 = arith.constant 0 : index
    %c0_7 = arith.constant 0 : index
    %10 = vector.load %arg4[%c0_6, %c0_7] : memref<512x512xbf16, #tpu.memory_space<vmem>>, vector<512x512xbf16>
    %cst_8 = arith.constant dense<0.000000e+00> : vector<8x512xf32>
    %11 = tpu.matmul %9, %10, %cst_8 {dimension_numbers = #tpu.dot_dimension_numbers<[1], [0], [0], [1], [0, 0, 1, 1], [], []>} : vector<8x512xbf16>, vector<512x512xbf16>, vector<8x512xf32> -> vector<8x512xf32>
    %c0_9 = arith.constant 0 : index
    %c0_10 = arith.constant 0 : index
    %12 = vector.load %arg5[%c0_9, %c0_10] : memref<1x512xf32, #tpu.memory_space<vmem>>, vector<1x512xf32>
    %13 = vector.broadcast %12 : vector<1x512xf32> to vector<8x512xf32>
    %14 = arith.addf %11, %13 : vector<8x512xf32>
    %cst_11 = arith.constant 0.000000e+00 : f32
    %15 = vector.broadcast %cst_11 : f32 to vector<8x512xf32>
    %16 = arith.maximumf %14, %15 : vector<8x512xf32>
    %17 = arith.truncf %16 : vector<8x512xf32> to vector<8x512xbf16>
    %c0_12 = arith.constant 0 : index
    %c0_13 = arith.constant 0 : index
    %18 = vector.load %arg6[%c0_12, %c0_13] : memref<512x512xbf16, #tpu.memory_space<vmem>>, vector<512x512xbf16>
    %cst_14 = arith.constant dense<0.000000e+00> : vector<8x512xf32>
    %19 = tpu.matmul %17, %18, %cst_14 {dimension_numbers = #tpu.dot_dimension_numbers<[1], [0], [0], [1], [0, 0, 1, 1], [], []>} : vector<8x512xbf16>, vector<512x512xbf16>, vector<8x512xf32> -> vector<8x512xf32>
    %c0_15 = arith.constant 0 : index
    %c0_16 = arith.constant 0 : index
    %20 = vector.load %arg7[%c0_15, %c0_16] : memref<1x512xf32, #tpu.memory_space<vmem>>, vector<1x512xf32>
    %21 = vector.broadcast %20 : vector<1x512xf32> to vector<8x512xf32>
    %22 = arith.addf %19, %21 : vector<8x512xf32>
    %cst_17 = arith.constant 0.000000e+00 : f32
    %23 = vector.broadcast %cst_17 : f32 to vector<8x512xf32>
    %24 = arith.maximumf %22, %23 : vector<8x512xf32>
    %25 = arith.truncf %24 : vector<8x512xf32> to vector<8x512xbf16>
    %c0_18 = arith.constant 0 : index
    %c0_19 = arith.constant 0 : index
    %26 = vector.load %arg8[%c0_18, %c0_19] : memref<512x128xbf16, #tpu.memory_space<vmem>>, vector<512x128xbf16>
    %cst_20 = arith.constant dense<0.000000e+00> : vector<8x128xf32>
    %27 = tpu.matmul %25, %26, %cst_20 {dimension_numbers = #tpu.dot_dimension_numbers<[1], [0], [0], [1], [0, 0, 1, 1], [], []>} : vector<8x512xbf16>, vector<512x128xbf16>, vector<8x128xf32> -> vector<8x128xf32>
    %c0_21 = arith.constant 0 : index
    %c0_22 = arith.constant 0 : index
    %28 = vector.load %arg9[%c0_21, %c0_22] : memref<1x128xf32, #tpu.memory_space<vmem>>, vector<1x128xf32>
    %29 = vector.broadcast %28 : vector<1x128xf32> to vector<8x128xf32>
    %30 = arith.addf %27, %29 : vector<8x128xf32>
    %31 = math.absf %30 : vector<8x128xf32>
    %cst_23 = arith.constant 1.000000e+00 : f32
    %32 = vector.broadcast %cst_23 : f32 to vector<8x128xf32>
    %33 = arith.addf %32, %31 : vector<8x128xf32>
    %34 = tpu.reciprocal %33 {approx = true} : vector<8x128xf32> -> vector<8x128xf32>
    %35 = arith.mulf %30, %34 : vector<8x128xf32>
    %c0_24 = arith.constant 0 : index
    %c0_25 = arith.constant 0 : index
    %36 = vector.load %arg10[%c0_24, %c0_25] : memref<8x128xf32, #tpu.memory_space<vmem>>, vector<8x128xf32>
    tpu.vector_store %arg10[%c0_24, %c0_25], %35 {strides = array<i32>} : memref<8x128xf32, #tpu.memory_space<vmem>>, vector<8x128xf32>,
    return
  }
  func.func @transform_0(%arg0: i32) -> (i32, i32) {
    %c0_i32 = arith.constant 0 : i32
    %c0_i32_0 = arith.constant 0 : i32
    return %arg0, %c0_i32 : i32, i32
  }
  func.func @transform_1(%arg0: i32) -> (i32, i32) {
    %c0_i32 = arith.constant 0 : i32
    %c0_i32_0 = arith.constant 0 : i32
    %c0_i32_1 = arith.constant 0 : i32
    return %c0_i32, %c0_i32_0 : i32, i32
  }
  func.func @transform_2(%arg0: i32) -> (i32, i32) {
    %c0_i32 = arith.constant 0 : i32
    %c0_i32_0 = arith.constant 0 : i32
    %c0_i32_1 = arith.constant 0 : i32
    return %c0_i32, %c0_i32_0 : i32, i32
  }
  func.func @transform_3(%arg0: i32) -> (i32, i32) {
    %c0_i32 = arith.constant 0 : i32
    %c0_i32_0 = arith.constant 0 : i32
    %c0_i32_1 = arith.constant 0 : i32
    return %c0_i32, %c0_i32_0 : i32, i32
  }
  func.func @transform_4(%arg0: i32) -> (i32, i32) {
    %c0_i32 = arith.constant 0 : i32
    %c0_i32_0 = arith.constant 0 : i32
    %c0_i32_1 = arith.constant 0 : i32
    return %c0_i32, %c0_i32_0 : i32, i32
  }
  func.func @transform_5(%arg0: i32) -> (i32, i32) {
    %c0_i32 = arith.constant 0 : i32
    %c0_i32_0 = arith.constant 0 : i32
    %c0_i32_1 = arith.constant 0 : i32
    return %c0_i32, %c0_i32_0 : i32, i32
  }
  func.func @transform_6(%arg0: i32) -> (i32, i32) {
    %c0_i32 = arith.constant 0 : i32
    %c0_i32_0 = arith.constant 0 : i32
    %c0_i32_1 = arith.constant 0 : i32
    return %c0_i32, %c0_i32_0 : i32, i32
  }
  func.func @transform_7(%arg0: i32) -> (i32, i32) {
    %c0_i32 = arith.constant 0 : i32
    %c0_i32_0 = arith.constant 0 : i32
    %c0_i32_1 = arith.constant 0 : i32
    return %c0_i32, %c0_i32_0 : i32, i32
  }
  func.func @transform_8(%arg0: i32) -> (i32, i32) {
    %c0_i32 = arith.constant 0 : i32
    %c0_i32_0 = arith.constant 0 : i32
    %c0_i32_1 = arith.constant 0 : i32
    return %c0_i32, %c0_i32_0 : i32, i32
  }
  func.func @transform_9(%arg0: i32) -> (i32, i32) {
    %c0_i32 = arith.constant 0 : i32
    %c0_i32_0 = arith.constant 0 : i32
    return %arg0, %c0_i32 : i32, i32
  }
}

</mosaic_0001>

<bundles_post_ra>
// kernel: _forward_impl.1
= control target key start
LH: loop header
LB: loop body
LE: loop exit
PB: predicated region body
PF: predicated region fallthrough
CT: control target
= control target key end

     0   :  { %s5511_s0 = inlined_call_operand.hbm [shape: f32[16,128], index: 0, kind: input, shape index: {}]   ;;  %s5512_s1 = inlined_call_operand.hbm [shape: bf16[128,512], index: 1, kind: input, shape index: {}]   ;;  %s5513_s2 = inlined_call_operand.hbm [shape: f32[1,512], index: 2, kind: input, shape index: {}]   ;;  %s5514_s3 = inlined_call_operand.hbm [shape: bf16[512,512], index: 3, kind: input, shape index: {}]   ;;  %s5515_s4 = inlined_call_operand.hbm [shape: f32[1,512], index: 4, kind: input, shape index: {}]   ;;  %s5516_s5 = inlined_call_operand.hbm [shape: bf16[512,512], index: 5, kind: input, shape index: {}]   ;;  %s5517_s6 = inlined_call_operand.vmem [shape: f32[1,512], index: 6, kind: input, shape index: {}]   ;;  %s5518_s7 = inlined_call_operand.hbm [shape: bf16[512,128], index: 7, kind: input, shape index: {}]   ;;  %s5519_s8 = inlined_call_operand.vmem [shape: f32[1,128], index: 8, kind: input, shape index: {}]   ;;  %s5520_s9 = inlined_call_operand.hbm [shape: f32[16,128], index: 9, kind: output, shape index: {}]  }
   0x1   :  { %5521 = sst [smem:[#allocation20_spill]] %s5512_s1 }
   0x2   :  { %5522 = sst [smem:[#allocation21_spill]] %s5513_s2 }
   0x3   :  { %5523 = sst [smem:[#allocation22_spill]] %s5514_s3 }
   0x4   :  { %5524 = sst [smem:[#allocation23_spill]] %s5515_s4 }
   0x5   :  { %14 = vsyncpa [#allocation3], 0 }
   0x6   :  { %16 = vsyncpa [#allocation3 + $0x1], 0 }
   0x7   :  { %17 = vsyncpa [#allocation6], 0 }
   0x8   :  { %18 = vsyncpa [#allocation9], 0 }
   0x9   :  { %19 = vsyncpa [#allocation12], 0 }
   0xa   :  { %20 = vsyncpa [#allocation4], 0 }
   0xb   :  { %22 = vsyncpa [#allocation4 + $0x1], 0  ;;  %s5245_s30 = smov 0   ;;  %s5247_s10 = smov 0  }
   0xc   :  { %s5249_s11 = smov 0   ;;  %s5251_s12 = smov 0  }
   0xd LB: > { %s5525_s1 = sld [smem:[#allocation20_spill]]  ;;  %s5269_s16 = sadd.s32 4294967295, %s5183_s12   ;;  %s5183_s12 = sphi %s5251_s12, %s5540_s12   ;;  %s5179_s11 = sphi %s5249_s11, %s5539_s11   ;;  %s5175_s10 = sphi %s5247_s10, %s5538_s10   ;;  %s5171_s30 = sphi %s5245_s30, %s5537_s30  }
   0xe   : > { %p3158_p0 = scmp.ge.s32.totalorder %s5183_s12, 1  ;;  %p49_p1 = scmp.eq.s32.totalorder %s5269_s16, 0 }
   0xf   : > { %p253_p2 = scmp.lt.s32.totalorder %s5183_s12, 3  ;;  %s5185_s18 = smov [#allocation5]  }
  0x10   : > { %s266_s19 = sshll.u32 %s5185_s18, 4  ;;  %s5527_s3 = sld [smem:[#allocation22_spill]]  ;;  %s267_s19 = int_to_ptr.vmem [resolvable:$true] %s266_s19 }
  0x11   : > { %p5274_p3 = pnand %p3158_p0, %p253_p2  ;;  %s316_s26 = sshll.u32 %s5516_s5, 4  ;;  %s317_s26 = int_to_ptr.hbm [resolvable:$true] %s316_s26 }
  0x12   : > { %s5186_s27 = smov [#allocation8]   ;;  %s5187_s29 = smov 256  }
  0x13   : > { %s264_s15 = sshll.u32 %s5525_s1, 4  ;;  %p4809_p4 = pneg %p5274_p3  ;;  %s265_s15 = int_to_ptr.hbm [resolvable:$true] %s264_s15 }
  0x14   : > { %s292_s28 = sshll.u32 %s5186_s27, 4  ;;  %s5188_s13 = smov 16   ;;  %s293_s28 = int_to_ptr.vmem [resolvable:$true] %s292_s28 }
  0x15   : > { %p5286_p6 = pnand %p4809_p4, %p49_p1  ;;  %s5529_s2 = sld [smem:[#allocation21_spill]] }
  0x16   : > { %s290_s22 = sshll.u32 %s5527_s3, 4  ;;  %s5189_s21 = smov [#allocation11]   ;;  %s291_s22 = int_to_ptr.hbm [resolvable:$true] %s290_s22 }
  0x17   : > { %4812 = dma.hbm_to_vmem [thread:$0]  (!%p5286_p6), %s265_s15, 4096, %s267_s19, [#allocation6], %s5187_s29, %s5187_s29, %s5188_s13  }
  0x18   : > { %4818 = dma.hbm_to_vmem [thread:$0]  (!%p5286_p6), %s291_s22, 16384, %s293_s28, [#allocation9], %s5187_s29, %s5187_s29, %s5188_s13  }
  0x19   : > { %s318_s1 = sshll.u32 %s5189_s21, 4  ;;  %s5190_s24 = smov [#allocation7]   ;;  %s319_s1 = int_to_ptr.vmem [resolvable:$true] %s318_s1 }
  0x1a   : > { %4824 = dma.hbm_to_vmem [thread:$0]  (!%p5286_p6), %s317_s26, 16384, %s319_s1, [#allocation12], %s5187_s29, %s5187_s29, %s5188_s13  }
  0x1b   : > { %s279_s20 = sshll.u32 %s5529_s2, 4  ;;  %s281_s25 = sshll.u32 %s5190_s24, 4  ;;  %s280_s20 = int_to_ptr.hbm [resolvable:$true] %s279_s20  ;;  %s282_s25 = int_to_ptr.vmem [resolvable:$true] %s281_s25 }
  0x1c   : > { %s5530_s4 = sld [smem:[#allocation23_spill]]  ;;  %s333_s28 = sshll.u32 %s5518_s7, 4  ;;  %s334_s28 = int_to_ptr.hbm [resolvable:$true] %s333_s28 }
  0x1d   : > { %4815 = dma.hbm_to_vmem [thread:$0]  (!%p5286_p6), %s280_s20, 64, %s282_s25, [#allocation6]  }
  0x1e   : > { %s5191_s1 = smov [#allocation10]   ;;  %s5192_s3 = smov [#allocation13]  }
  0x1f   : > { %s307_s26 = sshll.u32 %s5191_s1, 4  ;;  %s335_s29 = sshll.u32 %s5192_s3, 4  ;;  %s308_s26 = int_to_ptr.vmem [resolvable:$true] %s307_s26  ;;  %s336_s29 = int_to_ptr.vmem [resolvable:$true] %s335_s29 }
  0x20   : > { %s5193_s13 = smov 64   ;;  %s5194_s14 = smov 4  }
  0x21   : > { %4827 = dma.hbm_to_vmem [thread:$0]  (!%p5286_p6), %s334_s28, 4096, %s336_s29, [#allocation12], %s5193_s13, %s5193_s13, %s5194_s14  }
  0x22   : > { %s305_s15 = sshll.u32 %s5530_s4, 4  ;;  %s3157_s18 = sadd.s32 4294967294, %s5183_s12   ;;  %s306_s15 = int_to_ptr.hbm [resolvable:$true] %s305_s15 }
  0x23   : > { %4821 = dma.hbm_to_vmem [thread:$0]  (!%p5286_p6), %s306_s15, 64, %s308_s26, [#allocation9]  }
  0x24   : > { %s5316_s20 = sadd.s32 1, %s5183_s12   ;;  %s35_s24 = sadd.s32 1, %s5179_s11 }
  0x25   : > { %s32_s21 = ssub.s32 %s5183_s12, %s5316_s20  ;;  %p42_p8 = scmp.ne.s32.totalorder %s5179_s11, %s5175_s10 }
  0x26   : > { %p33_p7 = scmp.eq.s32.totalorder %s32_s21, 0  ;;  %p43_p9 = scmp.eq.s32.totalorder %s5183_s12, 0 }
  0x27   : > { %p48_p10 = scmp.ne.s32.totalorder %s5175_s10, %s5171_s30  ;;  %p240_p13 = scmp.eq.s32.totalorder %s5269_s16, 1 }
  0x28   : > { %s5327_s25 = scalar_select %p33_p7, %s5179_s11, %s35_s24  }
  0x29   : > { %p5329_p11 = por %p43_p9, %p42_p8  ;;  %p5335_p12 = por %p49_p1, %p48_p10 }
  0x2a   : > { %p246_p0 = scmp.eq.s32.totalorder %s3157_s18, 1  ;;  %p4842_p2 = scmp.lt.s32.totalorder %s5183_s12, 2 }
  0x2b   : > { %s352_s15 = sand.u32 1, %s5179_s11   ;;  %p5342_p4 = por %p240_p13, %p42_p8 }
  0x2c   : > { %p5346_p6 = por %p246_p0, %p48_p10  ;;  %s3166_s28 = sshll.u32 %s352_s15, 3 }
  0x2d   : > { %s3167_s1 = sshll.u32 %s5183_s12, 3  ;;  %s356_s13 = scalar_lea.vmem [#allocation2], %s3166_s28 }
  0x2e   : > { %s360_s29 = scalar_lea.hbm %s5511_s0, %s3167_s1  ;;  %s364_s14 = sshll.u32 %s356_s13, 4  ;;  %s365_s14 = int_to_ptr.vmem [resolvable:$true] %s364_s14 }
  0x2f   : > { %s362_s21 = sshll.u32 %s360_s29, 4  ;;  %p5356_p7 = pnand %p4842_p2, %p5329_p11  ;;  %s363_s21 = int_to_ptr.hbm [resolvable:$true] %s362_s21 }
  0x30   : > { %s353_s24 = scalar_lea.sflag [#allocation3], %s352_s15  ;;  %s5075_s2 = sshra.s32 %s363_s21, 4  ;;  %s5076_s2 = int_to_ptr.hbm [resolvable:$true] %s5075_s2 }
  0x31   : > { %s5077_s4 = scalar_lea.hbm %s5076_s2, 8  ;;  %p5079_p9 = pneg %p5356_p7 }
  0x32   : > { %p5078_p8 = scmp.ne.s32.totalorder %s5076_s2, %s5077_s4  ;;  %s5082_s26 = scalar_lea.hbm %s5511_s0, 16 }
  0x33   : > { %p5083_p11 = scmp.lt.s32.totalorder %s5076_s2, %s5511_s0  ;;  %p5084_p0 = scmp.lt.s32.totalorder %s5082_s26, %s5077_s4 }
  0x34   : > { %p5080_p10 = pnand %p5079_p9, %p5078_p8 }
  0x35   : > { %p5085_p2 = por %p5084_p0, %p5083_p11 }
  0x36   : > { %p5081_p13 = pneg %p5080_p10 }
  0x38   : > { %p5086_p5 = pnand %p5085_p2, %p5081_p13 }
  0x3a   : > { %5089 = shalt.err (!%p5086_p5)
}
  0x3b   : > { %4831 = dma.hbm_to_vmem [thread:$0]  (!%p5356_p7), %s363_s21, 128, %s365_s14, %s353_s24  }
  0x3c   : > { %373 = sbr.rel (%p5274_p3) target bundleno = 802 (0x322), region = 56  ;;  %s5373_s15 = sand.u32 (!%p5274_p3), 1, %s5175_s10  }
  0x3d   : > { %s3169_s29 = sshll.u32 (!%p5274_p3), %s5373_s15, 3  ;;  %s376_s13 = scalar_lea.sflag (!%p5274_p3), [#allocation3], %s5373_s15 }
  0x3e   : > { %s5379_s2 = scalar_lea.vmem (!%p5274_p3), [#allocation2], %s3169_s29 }
  0x41   : > { %5150 = dma.done.wait (%p5335_p12), %s376_s13, 128  }
  0x42   : > { %5152 = vsyncadd (%p5335_p12), %s376_s13, 4294967168 }
  0x43   : > { %5154 = dma.done.wait (%p49_p1), [#allocation6], 4160  }
  0x44   : > { %5156 = vsyncadd (%p49_p1), [#allocation6], 4294963136 }
  0x45   : > { %5158 = dma.done.wait (%p49_p1), [#allocation9], 16448  }
  0x46   : > { %5160 = vsyncadd (%p49_p1), [#allocation9], 4294950848 }
  0x47   : > { %5162 = dma.done.wait (%p49_p1), [#allocation12], 20480  }
  0x48   : > { %5164 = vsyncadd (%p49_p1), [#allocation12], 4294946816  ;;  %v3291_v0 = vld [vmem:[#allocation5 + $0xe0] sm:$0xf]  ;;  %v4491_v1 = vld [vmem:[#allocation5 + $0xec] sm:$0xf0] }
  0x49   : > { %v4489_v2 = vld [vmem:[#allocation5 + $0xe4] sm:$0xf]  ;;  %v3292_v3 = vor.u32 %v4491_v1, %v3291_v0  ;;  %v3293_v4 = vld [vmem:[#allocation5 + $0xf0] sm:$0xf0]  ;;  %v3299_v5 = vld [vmem:[#allocation5 + $0xe8] sm:$0xf] }
  0x4a   : > { %v4492_v6 = vld [vmem:[#allocation5 + $0xf4] sm:$0xf0]  ;;  %v3296_v7 = vor.u32 %v4489_v2, %v3293_v4  ;;  %v4490_v9 = vld [vmem:[#allocation5 + $0xec] sm:$0xf]  ;;  %v3301_v10 = vld [vmem:[#allocation5 + $0xf8] sm:$0xf0] }
  0x4b   : > { %v3300_v8 = vor.u32 %v4492_v6, %v3299_v5  ;;  %v3275_v11 = vld [vmem:[#allocation5 + $0xc0] sm:$0xf]  ;;  %649 = vmatpush.bf16.msra.mxu0 %v3292_v3  ;;  %v3304_v12 = vor.u32 %v4490_v9, %v3301_v10  ;;  %v4487_v13 = vld [vmem:[#allocation5 + $0xcc] sm:$0xf0]  ;;  %v4485_v14 = vld [vmem:[#allocation5 + $0xc4] sm:$0xf] }
  0x4c   : > { %v3277_v15 = vld [vmem:[#allocation5 + $0xd0] sm:$0xf0]  ;;  %662 = vmatpush.bf16.msra.mxu1 %v3296_v7  ;;  %v3276_v16 = vor.u32 %v4487_v13, %v3275_v11  ;;  %v3283_v18 = vld [vmem:[#allocation5 + $0xc8] sm:$0xf]  ;;  %v4488_v19 = vld [vmem:[#allocation5 + $0xd4] sm:$0xf0] }
  0x4d   : > { %675 = vmatpush.bf16.msra.mxu2 %v3300_v8  ;;  %v3280_v17 = vor.u32 %v4485_v14, %v3277_v15  ;;  %v4486_v20 = vld [vmem:[#allocation5 + $0xcc] sm:$0xf]  ;;  %688 = vmatpush.bf16.msra.mxu3 %v3304_v12  ;;  %v3284_v21 = vor.u32 %v4488_v19, %v3283_v18  ;;  %v3285_v22 = vld [vmem:[#allocation5 + $0xd8] sm:$0xf0]  ;;  %v3259_v23 = vld [vmem:[#allocation5 + $0xa0] sm:$0xf] }
  0x4e   : > { %v4483_v24 = vld [vmem:[#allocation5 + $0xac] sm:$0xf0]  ;;  %v3288_v25 = vor.u32 %v4486_v20, %v3285_v22  ;;  %v4481_v26 = vld [vmem:[#allocation5 + $0xa4] sm:$0xf]  ;;  %v3261_v27 = vld [vmem:[#allocation5 + $0xb0] sm:$0xf0] }
  0x4f   : > { %v3267_v28 = vld [vmem:[#allocation5 + $0xa8] sm:$0xf]  ;;  %650 = vmatpush.bf16.msra.mxu0 %v3276_v16  ;;  %v3260_v29 = vor.u32 %v4483_v24, %v3259_v23  ;;  %v4484_v30 = vld [vmem:[#allocation5 + $0xb4] sm:$0xf0]  ;;  %v4482_v31 = vld [vmem:[#allocation5 + $0xac] sm:$0xf]  ;;  %v3264_v33 = vor.u32 %v4481_v26, %v3261_v27 }
  0x50   : > { %v3269_v32 = vld [vmem:[#allocation5 + $0xb8] sm:$0xf0]  ;;  %663 = vmatpush.bf16.msra.mxu1 %v3280_v17  ;;  %v3268_v34 = vor.u32 %v4484_v30, %v3267_v28  ;;  %v3243_v35 = vld [vmem:[#allocation5 + $0x80] sm:$0xf]  ;;  %v4479_v36 = vld [vmem:[#allocation5 + $0x8c] sm:$0xf0] }
  0x51   : > { %676 = vmatpush.bf16.msra.mxu2 %v3284_v21  ;;  %v4477_v37 = vld [vmem:[#allocation5 + $0x84] sm:$0xf]  ;;  %689 = vmatpush.bf16.msra.mxu3 %v3288_v25  ;;  %v3272_v38 = vor.u32 %v4482_v31, %v3269_v32  ;;  %v3245_v39 = vld [vmem:[#allocation5 + $0x90] sm:$0xf0]  ;;  %v3251_v40 = vld [vmem:[#allocation5 + $0x88] sm:$0xf]  ;;  %v3244_v44 = vor.u32 %v4479_v36, %v3243_v35 }
  0x52   : > { %v4480_v41 = vld [vmem:[#allocation5 + $0x94] sm:$0xf0]  ;;  %v4478_v42 = vld [vmem:[#allocation5 + $0x8c] sm:$0xf]  ;;  %v3253_v43 = vld [vmem:[#allocation5 + $0x98] sm:$0xf0]  ;;  %v3248_v45 = vor.u32 %v4477_v37, %v3245_v39 }
  0x53   : > { %651 = vmatpush.bf16.msra.mxu0 %v3260_v29  ;;  %v3252_v46 = vor.u32 %v4480_v41, %v3251_v40  ;;  %v3227_v47 = vld [vmem:[#allocation5 + $0x60] sm:$0xf]  ;;  %v4475_v48 = vld [vmem:[#allocation5 + $0x6c] sm:$0xf0]  ;;  %v4473_v49 = vld [vmem:[#allocation5 + $0x64] sm:$0xf]  ;;  %v3256_v50 = vor.u32 %v4478_v42, %v3253_v43 }
  0x54   : > { %664 = vmatpush.bf16.msra.mxu1 %v3264_v33  ;;  %v3229_v51 = vld [vmem:[#allocation5 + $0x70] sm:$0xf0]  ;;  %v3235_v52 = vld [vmem:[#allocation5 + $0x68] sm:$0xf]  ;;  %v4476_v53 = vld [vmem:[#allocation5 + $0x74] sm:$0xf0]  ;;  %v3228_v56 = vor.u32 %v4475_v48, %v3227_v47 }
  0x55   : > { %677 = vmatpush.bf16.msra.mxu2 %v3268_v34  ;;  %690 = vmatpush.bf16.msra.mxu3 %v3272_v38  ;;  %v4474_v54 = vld [vmem:[#allocation5 + $0x6c] sm:$0xf]  ;;  %v3237_v55 = vld [vmem:[#allocation5 + $0x78] sm:$0xf0]  ;;  %v3232_v57 = vor.u32 %v4473_v49, %v3229_v51  ;;  %v3236_v58 = vor.u32 %v4476_v53, %v3235_v52  ;;  %v3211_v59 = vld [vmem:[#allocation5 + $0x40] sm:$0xf] }
  0x56   : > { %v4471_v60 = vld [vmem:[#allocation5 + $0x4c] sm:$0xf0]  ;;  %v4469_v61 = vld [vmem:[#allocation5 + $0x44] sm:$0xf]  ;;  %v3240_v62 = vor.u32 %v4474_v54, %v3237_v55  ;;  %v3213_v63 = vld [vmem:[#allocation5 + $0x50] sm:$0xf0] }
  0x57   : > { %652 = vmatpush.bf16.msra.mxu0 %v3244_v44  ;;  %v3219_v0 = vld [vmem:[#allocation5 + $0x48] sm:$0xf]  ;;  %v4472_v1 = vld [vmem:[#allocation5 + $0x54] sm:$0xf0]  ;;  %v4470_v2 = vld [vmem:[#allocation5 + $0x4c] sm:$0xf]  ;;  %v3212_v4 = vor.u32 %v4471_v60, %v3211_v59  ;;  %v3216_v5 = vor.u32 %v4469_v61, %v3213_v63 }
  0x58   : > { %665 = vmatpush.bf16.msra.mxu1 %v3248_v45  ;;  %v3221_v3 = vld [vmem:[#allocation5 + $0x58] sm:$0xf0]  ;;  %v3220_v6 = vor.u32 %v4472_v1, %v3219_v0  ;;  %v3195_v7 = vld [vmem:[#allocation5 + $0x20] sm:$0xf]  ;;  %v4467_v8 = vld [vmem:[#allocation5 + $0x2c] sm:$0xf0] }
  0x59   : > { %678 = vmatpush.bf16.msra.mxu2 %v3252_v46  ;;  %691 = vmatpush.bf16.msra.mxu3 %v3256_v50  ;;  %v4465_v9 = vld [vmem:[#allocation5 + $0x24] sm:$0xf]  ;;  %v3224_v10 = vor.u32 %v4470_v2, %v3221_v3  ;;  %v3197_v11 = vld [vmem:[#allocation5 + $0x30] sm:$0xf0]  ;;  %v3203_v12 = vld [vmem:[#allocation5 + $0x28] sm:$0xf]  ;;  %v3196_v16 = vor.u32 %v4467_v8, %v3195_v7 }
  0x5a   : > { %v4468_v13 = vld [vmem:[#allocation5 + $0x34] sm:$0xf0]  ;;  %v4466_v14 = vld [vmem:[#allocation5 + $0x2c] sm:$0xf]  ;;  %v3205_v15 = vld [vmem:[#allocation5 + $0x38] sm:$0xf0]  ;;  %v3200_v18 = vor.u32 %v4465_v9, %v3197_v11 }
  0x5b   : > { %653 = vmatpush.bf16.msra.mxu0 %v3228_v56  ;;  %v3179_v17 = vld [vmem:[#allocation5] sm:$0xf]  ;;  %v3204_v19 = vor.u32 %v4468_v13, %v3203_v12  ;;  %v4463_v20 = vld [vmem:[#allocation5 + $0xc] sm:$0xf0]  ;;  %v4461_v21 = vld [vmem:[#allocation5 + $0x4] sm:$0xf]  ;;  %v3208_v23 = vor.u32 %v4466_v14, %v3205_v15 }
  0x5c   : > { %666 = vmatpush.bf16.msra.mxu1 %v3232_v57  ;;  %v3181_v22 = vld [vmem:[#allocation5 + $0x10] sm:$0xf0]  ;;  %v3187_v24 = vld [vmem:[#allocation5 + $0x8] sm:$0xf]  ;;  %v4464_v25 = vld [vmem:[#allocation5 + $0x14] sm:$0xf0]  ;;  %v3180_v30 = vor.u32 %v4463_v20, %v3179_v17 }
  0x5d   : > { %679 = vmatpush.bf16.msra.mxu2 %v3236_v58  ;;  %692 = vmatpush.bf16.msra.mxu3 %v3240_v62  ;;  %v4462_v26 = vld [vmem:[#allocation5 + $0xc] sm:$0xf]  ;;  %v3189_v27 = vld [vmem:[#allocation5 + $0x18] sm:$0xf0]  ;;  %v3419_v28 = vld [vmem:[#allocation8 + $0xe0] sm:$0xf]  ;;  %v3184_v34 = vor.u32 %v4461_v21, %v3181_v22  ;;  %v3188_v35 = vor.u32 %v4464_v25, %v3187_v24 }
  0x5e   : > { %v4523_v29 = vld [vmem:[#allocation8 + $0xec] sm:$0xf0]  ;;  %v3547_v32 = vld [vmem:[#allocation8 + $0x1e0] sm:$0xf]  ;;  %v3192_v36 = vor.u32 %v4462_v26, %v3189_v27  ;;  %s4458_s21 = sshll.u32 %s5269_s16, 3  ;;  %s444_s1 = scalar_lea.vmem [#allocation14], %s3169_s29 }
  0x5f   : > { %654 = vmatpush.bf16.msra.mxu0 %v3212_v4  ;;  %v445_v31 = vld [vmem:[%s5379_s2] sm:$0xff]  ;;  %v3420_v37 = vor.u32 %v4523_v29, %v3419_v28  ;;  %v3403_v38 = vld [vmem:[#allocation8 + $0xc0] sm:$0xf]  ;;  %s3025_s28 = scalar_lea.hbm %s5520_s9, %s4458_s21  ;;  %s3027_s26 = sshll.u32 %s444_s1, 4  ;;  %s3028_s26 = int_to_ptr.vmem [resolvable:$true] %s3027_s26 }
  0x60   : > { %667 = vmatpush.bf16.msra.mxu1 %v3216_v5  ;;  %v4555_v33 = vld [vmem:[#allocation8 + $0x1ec] sm:$0xf0]  ;;  %v3675_v39 = vld [vmem:[#allocation8 + $0x2e0] sm:$0xf]  ;;  %v446_v41 = vpack.c.bf16 %v445_v31, %v445_v31  ;;  %s3029_s3 = sshll.u32 %s3025_s28, 4  ;;  %s3015_s27 = scalar_lea.sflag [#allocation4], %s5373_s15  ;;  %s3030_s3 = int_to_ptr.hbm [resolvable:$true] %s3029_s3 }
  0x61   : > { %680 = vmatpush.bf16.msra.mxu2 %v3220_v6  ;;  %693 = vmatpush.bf16.msra.mxu3 %v3224_v10  ;;  %v4587_v40 = vld [vmem:[#allocation8 + $0x2ec] sm:$0xf0]  ;;  %v3548_v42 = vor.u32 %v4555_v33, %v3547_v32  ;;  %v3803_v44 = vld [vmem:[#allocation8 + $0x3e0] sm:$0xf]  ;;  %s5119_s13 = sshra.s32 %s3030_s3, 4  ;;  %s5125_s17 = scalar_lea.hbm %s5520_s9, 16  ;;  %s5120_s13 = int_to_ptr.hbm [resolvable:$true] %s5119_s13 }
  0x62   : > { %v4519_v43 = vld [vmem:[#allocation8 + $0xcc] sm:$0xf0]  ;;  %v3531_v46 = vld [vmem:[#allocation8 + $0x1c0] sm:$0xf]  ;;  %v3676_v48 = vor.u32 %v4587_v40, %v3675_v39  ;;  %s5121_s16 = scalar_lea.hbm %s5120_s13, 8  ;;  %p5126_p12 = scmp.lt.s32.totalorder %s5120_s13, %s5520_s9 }
  0x63   : > { %655 = vmatpush.bf16.msra.mxu0 %v3196_v16  ;;  %v4619_v45 = vld [vmem:[#allocation8 + $0x3ec] sm:$0xf0]  ;;  %v3404_v49 = vor.u32 %v4519_v43, %v3403_v38  ;;  %v3387_v51 = vld [vmem:[#allocation8 + $0xa0] sm:$0xf]  ;;  %p5122_p1 = scmp.ne.s32.totalorder %s5120_s13, %s5121_s16  ;;  %p5127_p7 = scmp.lt.s32.totalorder %s5125_s17, %s5121_s16 }
  0x64   : > { %668 = vmatpush.bf16.msra.mxu1 %v3200_v18  ;;  %v4551_v47 = vld [vmem:[#allocation8 + $0x1cc] sm:$0xf0]  ;;  %v3804_v50 = vor.u32 %v4619_v45, %v3803_v44  ;;  %v3659_v52 = vld [vmem:[#allocation8 + $0x2c0] sm:$0xf] }
  0x65   : > { %681 = vmatpush.bf16.msra.mxu2 %v3204_v19  ;;  %694 = vmatpush.bf16.msra.mxu3 %v3208_v23  ;;  %v4583_v53 = vld [vmem:[#allocation8 + $0x2cc] sm:$0xf0]  ;;  %v3532_v54 = vor.u32 %v4551_v47, %v3531_v46  ;;  %v3787_v56 = vld [vmem:[#allocation8 + $0x3c0] sm:$0xf]  ;;  %p5123_p3 = pnand %p5122_p1, %p5342_p4  ;;  %p5128_p8 = por %p5127_p7, %p5126_p12 }
  0x66   : > { %v4515_v55 = vld [vmem:[#allocation8 + $0xac] sm:$0xf0]  ;;  %v3515_v58 = vld [vmem:[#allocation8 + $0x1a0] sm:$0xf]  ;;  %v3660_v60 = vor.u32 %v4583_v53, %v3659_v52 }
  0x67   : > { %656 = vmatpush.bf16.msra.mxu0 %v3180_v30  ;;  %v4615_v57 = vld [vmem:[#allocation8 + $0x3cc] sm:$0xf0]  ;;  %v3388_v61 = vor.u32 %v4515_v55, %v3387_v51  ;;  %v3371_v63 = vld [vmem:[#allocation8 + $0x80] sm:$0xf]  ;;  %p5124_p5 = pneg %p5123_p3 }
  0x68   : > { %669 = vmatpush.bf16.msra.mxu1 %v3184_v34  ;;  %v4547_v59 = vld [vmem:[#allocation8 + $0x1ac] sm:$0xf0]  ;;  %v3788_v62 = vor.u32 %v4615_v57, %v3787_v56  ;;  %v3643_v0 = vld [vmem:[#allocation8 + $0x2a0] sm:$0xf]  ;;  %v4521_v56 = vld [vmem:[#allocation8 + $0xe4] sm:$0xf] }
  0x69   : > { %682 = vmatpush.bf16.msra.mxu2 %v3188_v35  ;;  %695 = vmatpush.bf16.msra.mxu3 %v3192_v36  ;;  %v4579_v1 = vld [vmem:[#allocation8 + $0x2ac] sm:$0xf0]  ;;  %v3516_v2 = vor.u32 %v4547_v59, %v3515_v58  ;;  %v3771_v4 = vld [vmem:[#allocation8 + $0x3a0] sm:$0xf]  ;;  %v3421_v57 = vld [vmem:[#allocation8 + $0xf0] sm:$0xf0]  ;;  %p5129_p9 = pnand %p5128_p8, %p5124_p5 }
  0x6a   : > { %657 = vmatmul.bf16.vlgmr.msra.gmra.mxu0 %v446_v41  ;;  %v4511_v3 = vld [vmem:[#allocation8 + $0x8c] sm:$0xf0]  ;;  %v3499_v6 = vld [vmem:[#allocation8 + $0x180] sm:$0xf]  ;;  %v3644_v8 = vor.u32 %v4579_v1, %v3643_v0  ;;  %v4553_v58 = vld [vmem:[#allocation8 + $0x1e4] sm:$0xf] }
  0x6b   : > { %1487 = vmatpush.bf16.msrb.mxu0 %v3420_v37  ;;  %670 = vmatmul.bf16.vlgmr.msra.gmra.mxu1 %v446_v41  ;;  %v4611_v5 = vld [vmem:[#allocation8 + $0x3ac] sm:$0xf0]  ;;  %v3372_v9 = vor.u32 %v4511_v3, %v3371_v63  ;;  %v3355_v11 = vld [vmem:[#allocation8 + $0x60] sm:$0xf]  ;;  %v3549_v59 = vld [vmem:[#allocation8 + $0x1f0] sm:$0xf0] }
  0x6c   : > { %1500 = vmatpush.bf16.msrb.mxu1 %v3548_v42  ;;  %683 = vmatmul.bf16.vlgmr.msra.gmra.mxu2 %v446_v41  ;;  %v4543_v7 = vld [vmem:[#allocation8 + $0x18c] sm:$0xf0]  ;;  %v3772_v10 = vor.u32 %v4611_v5, %v3771_v4  ;;  %v3627_v12 = vld [vmem:[#allocation8 + $0x280] sm:$0xf]  ;;  %v4517_v63 = vld [vmem:[#allocation8 + $0xc4] sm:$0xf]  ;;  %v3424_v4 = vor.u32 %v4521_v56, %v3421_v57 }
  0x6d   : > { %696 = vmatmul.bf16.vlgmr.msra.gmra.mxu3 %v446_v41  ;;  %1513 = vmatpush.bf16.msrb.mxu2 %v3676_v48  ;;  %v4575_v13 = vld [vmem:[#allocation8 + $0x28c] sm:$0xf0]  ;;  %v3500_v14 = vor.u32 %v4543_v7, %v3499_v6  ;;  %v3755_v16 = vld [vmem:[#allocation8 + $0x380] sm:$0xf]  ;;  %v4585_v6 = vld [vmem:[#allocation8 + $0x2e4] sm:$0xf] }
  0x6e   : > { %1526 = vmatpush.bf16.msrb.mxu3 %v3804_v50  ;;  %v4507_v15 = vld [vmem:[#allocation8 + $0x6c] sm:$0xf0]  ;;  %v3483_v18 = vld [vmem:[#allocation8 + $0x160] sm:$0xf]  ;;  %v3628_v20 = vor.u32 %v4575_v13, %v3627_v12  ;;  %v3677_v7 = vld [vmem:[#allocation8 + $0x2f0] sm:$0xf0] }
  0x6f   : > { %1488 = vmatpush.bf16.msrb.mxu0 %v3404_v49  ;;  %v4607_v17 = vld [vmem:[#allocation8 + $0x38c] sm:$0xf0]  ;;  %v3356_v21 = vor.u32 %v4507_v15, %v3355_v11  ;;  %v3339_v23 = vld [vmem:[#allocation8 + $0x40] sm:$0xf]  ;;  %v3805_v11 = vld [vmem:[#allocation8 + $0x3f0] sm:$0xf0] }
  0x70   : > { %1501 = vmatpush.bf16.msrb.mxu1 %v3532_v54  ;;  %v4539_v19 = vld [vmem:[#allocation8 + $0x16c] sm:$0xf0]  ;;  %v3756_v22 = vor.u32 %v4607_v17, %v3755_v16  ;;  %v3611_v24 = vld [vmem:[#allocation8 + $0x260] sm:$0xf]  ;;  %v4549_v12 = vld [vmem:[#allocation8 + $0x1c4] sm:$0xf]  ;;  %v3680_v16 = vor.u32 %v4585_v6, %v3677_v7 }
  0x71   : > { %1514 = vmatpush.bf16.msrb.mxu2 %v3660_v60  ;;  %v4571_v25 = vld [vmem:[#allocation8 + $0x26c] sm:$0xf0]  ;;  %v3484_v26 = vor.u32 %v4539_v19, %v3483_v18  ;;  %v3739_v28 = vld [vmem:[#allocation8 + $0x360] sm:$0xf]  ;;  %v3533_v13 = vld [vmem:[#allocation8 + $0x1d0] sm:$0xf0] }
  0x72   : > { %1527 = vmatpush.bf16.msrb.mxu3 %v3788_v62  ;;  %v4503_v27 = vld [vmem:[#allocation8 + $0x4c] sm:$0xf0]  ;;  %v3467_v30 = vld [vmem:[#allocation8 + $0x140] sm:$0xf]  ;;  %v3612_v32 = vor.u32 %v4571_v25, %v3611_v24  ;;  %v4513_v19 = vld [vmem:[#allocation8 + $0xa4] sm:$0xf] }
  0x73   : > { %1489 = vmatpush.bf16.msrb.mxu0 %v3388_v61  ;;  %v4603_v29 = vld [vmem:[#allocation8 + $0x36c] sm:$0xf0]  ;;  %v3340_v33 = vor.u32 %v4503_v27, %v3339_v23  ;;  %v3323_v35 = vld [vmem:[#allocation8 + $0x20] sm:$0xf]  ;;  %v3389_v23 = vld [vmem:[#allocation8 + $0xb0] sm:$0xf0] }
  0x74   : > { %1502 = vmatpush.bf16.msrb.mxu1 %v3516_v2  ;;  %v4535_v31 = vld [vmem:[#allocation8 + $0x14c] sm:$0xf0]  ;;  %v3740_v34 = vor.u32 %v4603_v29, %v3739_v28  ;;  %v3595_v36 = vld [vmem:[#allocation8 + $0x240] sm:$0xf]  ;;  %v4613_v24 = vld [vmem:[#allocation8 + $0x3c4] sm:$0xf]  ;;  %v3392_v29 = vor.u32 %v4513_v19, %v3389_v23 }
  0x75   : > { %1515 = vmatpush.bf16.msrb.mxu2 %v3644_v8  ;;  %v4567_v37 = vld [vmem:[#allocation8 + $0x24c] sm:$0xf0]  ;;  %v3468_v38 = vor.u32 %v4535_v31, %v3467_v30  ;;  %v3723_v40 = vld [vmem:[#allocation8 + $0x340] sm:$0xf]  ;;  %v3552_v8 = vor.u32 %v4553_v58, %v3549_v59  ;;  %v3789_v25 = vld [vmem:[#allocation8 + $0x3d0] sm:$0xf0] }
  0x76   : > { %1528 = vmatpush.bf16.msrb.mxu3 %v3772_v10  ;;  %v4499_v39 = vld [vmem:[#allocation8 + $0x2c] sm:$0xf0]  ;;  %v3451_v42 = vld [vmem:[#allocation8 + $0x120] sm:$0xf]  ;;  %v3596_v44 = vor.u32 %v4567_v37, %v3595_v36  ;;  %v4617_v10 = vld [vmem:[#allocation8 + $0x3e4] sm:$0xf]  ;;  %v3792_v30 = vor.u32 %v4613_v24, %v3789_v25 }
  0x77   : > { %1490 = vmatpush.bf16.msrb.mxu0 %v3372_v9  ;;  %v4599_v41 = vld [vmem:[#allocation8 + $0x34c] sm:$0xf0]  ;;  %v3307_v45 = vld [vmem:[#allocation8] sm:$0xf]  ;;  %v3324_v46 = vor.u32 %v4499_v39, %v3323_v35  ;;  %v3405_v9 = vld [vmem:[#allocation8 + $0xd0] sm:$0xf0]  ;;  %v3808_v18 = vor.u32 %v4617_v10, %v3805_v11 }
  0x78   : > { %1503 = vmatpush.bf16.msrb.mxu1 %v3500_v14  ;;  %v4531_v43 = vld [vmem:[#allocation8 + $0x12c] sm:$0xf0]  ;;  %v3724_v47 = vor.u32 %v4599_v41, %v3723_v40  ;;  %v3579_v49 = vld [vmem:[#allocation8 + $0x220] sm:$0xf]  ;;  %v3408_v17 = vor.u32 %v4517_v63, %v3405_v9  ;;  %v3517_v27 = vld [vmem:[#allocation8 + $0x1b0] sm:$0xf0] }
  0x79   : > { %1516 = vmatpush.bf16.msrb.mxu2 %v3628_v20  ;;  %v4495_v48 = vld [vmem:[#allocation8 + $0xc] sm:$0xf0]  ;;  %v3452_v51 = vor.u32 %v4531_v43, %v3451_v42  ;;  %v3435_v52 = vld [vmem:[#allocation8 + $0x100] sm:$0xf]  ;;  %v4581_v20 = vld [vmem:[#allocation8 + $0x2c4] sm:$0xf] }
  0x7a   : > { %1529 = vmatpush.bf16.msrb.mxu3 %v3756_v22  ;;  %v4563_v50 = vld [vmem:[#allocation8 + $0x22c] sm:$0xf0]  ;;  %v3707_v53 = vld [vmem:[#allocation8 + $0x320] sm:$0xf]  ;;  %v3308_v61 = vor.u32 %v4495_v48, %v3307_v45  ;;  %v3536_v22 = vor.u32 %v4549_v12, %v3533_v13  ;;  %v4509_v31 = vld [vmem:[#allocation8 + $0x84] sm:$0xf] }
  0x7b   : > { %1491 = vmatpush.bf16.msrb.mxu0 %v3356_v21  ;;  %v4595_v54 = vld [vmem:[#allocation8 + $0x32c] sm:$0xf0]  ;;  %v3580_v60 = vor.u32 %v4563_v50, %v3579_v49  ;;  %v3563_v0 = vld [vmem:[#allocation8 + $0x200] sm:$0xf]  ;;  %v3661_v21 = vld [vmem:[#allocation8 + $0x2d0] sm:$0xf0] }
  0x7c   : > { %1504 = vmatpush.bf16.msrb.mxu1 %v3484_v26  ;;  %v4527_v55 = vld [vmem:[#allocation8 + $0x10c] sm:$0xf0]  ;;  %v3708_v62 = vor.u32 %v4595_v54, %v3707_v53  ;;  %v3691_v2 = vld [vmem:[#allocation8 + $0x300] sm:$0xf]  ;;  %v4545_v26 = vld [vmem:[#allocation8 + $0x1a4] sm:$0xf]  ;;  %v3664_v28 = vor.u32 %v4581_v20, %v3661_v21 }
  0x7d   : > { %1517 = vmatpush.bf16.msrb.mxu2 %v3612_v32  ;;  %v4559_v1 = vld [vmem:[#allocation8 + $0x20c] sm:$0xf0]  ;;  %v3436_v3 = vor.u32 %v4527_v55, %v3435_v52  ;;  %v4577_v32 = vld [vmem:[#allocation8 + $0x2a4] sm:$0xf]  ;;  %v3373_v35 = vld [vmem:[#allocation8 + $0x90] sm:$0xf0] }
  0x7e   : > { %1530 = vmatpush.bf16.msrb.mxu3 %v3740_v34  ;;  %v4591_v5 = vld [vmem:[#allocation8 + $0x30c] sm:$0xf0]  ;;  %v3564_v14 = vor.u32 %v4559_v1, %v3563_v0  ;;  %v3520_v34 = vor.u32 %v4545_v26, %v3517_v27  ;;  %v4609_v36 = vld [vmem:[#allocation8 + $0x3a4] sm:$0xf]  ;;  %v3773_v37 = vld [vmem:[#allocation8 + $0x3b0] sm:$0xf0]  ;;  %v3376_v41 = vor.u32 %v4509_v31, %v3373_v35 }
  0x7f   : > { %1492 = vmatpush.bf16.msrb.mxu0 %v3340_v33  ;;  %v3692_v15 = vor.u32 %v4591_v5, %v3691_v2  ;;  %v3645_v33 = vld [vmem:[#allocation8 + $0x2b0] sm:$0xf0]  ;;  %v3776_v42 = vor.u32 %v4609_v36, %v3773_v37  ;;  %v4505_v43 = vld [vmem:[#allocation8 + $0x64] sm:$0xf] }
  0x80   : > { %1505 = vmatpush.bf16.msrb.mxu1 %v3468_v38  ;;  %v4541_v38 = vld [vmem:[#allocation8 + $0x184] sm:$0xf]  ;;  %v3501_v39 = vld [vmem:[#allocation8 + $0x190] sm:$0xf0]  ;;  %v3648_v40 = vor.u32 %v4577_v32, %v3645_v33 }
  0x81   : > { %1518 = vmatpush.bf16.msrb.mxu2 %v3596_v44  ;;  %v4573_v44 = vld [vmem:[#allocation8 + $0x284] sm:$0xf]  ;;  %v3629_v45 = vld [vmem:[#allocation8 + $0x290] sm:$0xf0] }
  0x82   : > { %1531 = vmatpush.bf16.msrb.mxu3 %v3724_v47  ;;  %v3357_v47 = vld [vmem:[#allocation8 + $0x70] sm:$0xf0]  ;;  %v4605_v48 = vld [vmem:[#allocation8 + $0x384] sm:$0xf]  ;;  %v3632_v52 = vor.u32 %v4573_v44, %v3629_v45  ;;  %v4556_v44 = vld [vmem:[#allocation8 + $0x1f4] sm:$0xf0] }
  0x83   : > { %1493 = vmatpush.bf16.msrb.mxu0 %v3324_v46  ;;  %v3504_v46 = vor.u32 %v4541_v38, %v3501_v39  ;;  %v3757_v49 = vld [vmem:[#allocation8 + $0x390] sm:$0xf0]  ;;  %v4537_v50 = vld [vmem:[#allocation8 + $0x164] sm:$0xf]  ;;  %v3360_v53 = vor.u32 %v4505_v43, %v3357_v47  ;;  %v3555_v43 = vld [vmem:[#allocation8 + $0x1e8] sm:$0xf] }
  0x84   : > { %1506 = vmatpush.bf16.msrb.mxu1 %v3452_v51  ;;  %v3485_v51 = vld [vmem:[#allocation8 + $0x170] sm:$0xf0]  ;;  %v3760_v54 = vor.u32 %v4605_v48, %v3757_v49  ;;  %v4501_v56 = vld [vmem:[#allocation8 + $0x44] sm:$0xf] }
  0x85   : > { %1519 = vmatpush.bf16.msrb.mxu2 %v3580_v60  ;;  %v3488_v55 = vor.u32 %v4537_v50, %v3485_v51  ;;  %v3341_v57 = vld [vmem:[#allocation8 + $0x50] sm:$0xf0]  ;;  %v4533_v58 = vld [vmem:[#allocation8 + $0x144] sm:$0xf]  ;;  %v3556_v51 = vor.u32 %v4556_v44, %v3555_v43 }
  0x86   : > { %1532 = vmatpush.bf16.msrb.mxu3 %v3708_v62  ;;  %v3469_v59 = vld [vmem:[#allocation8 + $0x150] sm:$0xf0]  ;;  %v3344_v60 = vor.u32 %v4501_v56, %v3341_v57  ;;  %v4569_v62 = vld [vmem:[#allocation8 + $0x264] sm:$0xf]  ;;  %v4552_v56 = vld [vmem:[#allocation8 + $0x1d4] sm:$0xf0] }
  0x87   : > { %1494 = vmatpush.bf16.msrb.mxu0 %v3308_v61  ;;  %v3472_v61 = vor.u32 %v4533_v58, %v3469_v59  ;;  %v3613_v63 = vld [vmem:[#allocation8 + $0x270] sm:$0xf0]  ;;  %v4601_v0 = vld [vmem:[#allocation8 + $0x364] sm:$0xf] }
  0x88   : > { %1507 = vmatpush.bf16.msrb.mxu1 %v3436_v3  ;;  %v3616_v1 = vor.u32 %v4569_v62, %v3613_v63  ;;  %v3741_v2 = vld [vmem:[#allocation8 + $0x370] sm:$0xf0]  ;;  %v4529_v7 = vld [vmem:[#allocation8 + $0x124] sm:$0xf]  ;;  %v3683_v62 = vld [vmem:[#allocation8 + $0x2e8] sm:$0xf] }
  0x89   : > { %1520 = vmatpush.bf16.msrb.mxu2 %v3564_v14  ;;  %v3744_v3 = vor.u32 %v4601_v0, %v3741_v2  ;;  %v3325_v5 = vld [vmem:[#allocation8 + $0x30] sm:$0xf0]  ;;  %v4565_v10 = vld [vmem:[#allocation8 + $0x244] sm:$0xf]  ;;  %v4588_v63 = vld [vmem:[#allocation8 + $0x2f4] sm:$0xf0] }
  0x8a   : > { %1533 = vmatpush.bf16.msrb.mxu3 %v3692_v15  ;;  %v3597_v11 = vld [vmem:[#allocation8 + $0x250] sm:$0xf0]  ;;  %v4597_v12 = vld [vmem:[#allocation8 + $0x344] sm:$0xf]  ;;  %v3811_v0 = vld [vmem:[#allocation8 + $0x3e8] sm:$0xf] }
  0x8b   : > { %1539 = vmatpush.bf16.msra.mxu0 %v3424_v4  ;;  %v4497_v4 = vld [vmem:[#allocation8 + $0x24] sm:$0xf]  ;;  %v3600_v13 = vor.u32 %v4565_v10, %v3597_v11  ;;  %v3725_v14 = vld [vmem:[#allocation8 + $0x350] sm:$0xf0]  ;;  %v3684_v11 = vor.u32 %v4588_v63, %v3683_v62  ;;  %v4500_v62 = vld [vmem:[#allocation8 + $0x34] sm:$0xf0] }
  0x8c   : > { %1552 = vmatpush.bf16.msra.mxu1 %v3552_v8  ;;  %v3328_v6 = vor.u32 %v4497_v4, %v3325_v5  ;;  %v3453_v8 = vld [vmem:[#allocation8 + $0x130] sm:$0xf0]  ;;  %v3728_v15 = vor.u32 %v4597_v12, %v3725_v14  ;;  %v4593_v25 = vld [vmem:[#allocation8 + $0x324] sm:$0xf]  ;;  %v4620_v4 = vld [vmem:[#allocation8 + $0x3f4] sm:$0xf0] }
  0x8d   : > { %1565 = vmatpush.bf16.msra.mxu2 %v3680_v16  ;;  %v3456_v9 = vor.u32 %v4529_v7, %v3453_v8  ;;  %v4493_v16 = vld [vmem:[#allocation8 + $0x4] sm:$0xf]  ;;  %v3437_v20 = vld [vmem:[#allocation8 + $0x110] sm:$0xf0]  ;;  %v3395_v5 = vld [vmem:[#allocation8 + $0xa8] sm:$0xf] }
  0x8e   : > { %1578 = vmatpush.bf16.msra.mxu3 %v3808_v18  ;;  %v4525_v18 = vld [vmem:[#allocation8 + $0x104] sm:$0xf]  ;;  %v3581_v23 = vld [vmem:[#allocation8 + $0x230] sm:$0xf0]  ;;  %v3523_v8 = vld [vmem:[#allocation8 + $0x1a8] sm:$0xf] }
  0x8f   : > { %1540 = vmatpush.bf16.msra.mxu0 %v3408_v17  ;;  %v3309_v17 = vld [vmem:[#allocation8 + $0x10] sm:$0xf0]  ;;  %v3440_v21 = vor.u32 %v4525_v18, %v3437_v20  ;;  %v4589_v31 = vld [vmem:[#allocation8 + $0x304] sm:$0xf]  ;;  %v4616_v20 = vld [vmem:[#allocation8 + $0x3d4] sm:$0xf0] }
  0x90   : > { %1553 = vmatpush.bf16.msra.mxu1 %v3536_v22  ;;  %v3312_v19 = vor.u32 %v4493_v16, %v3309_v17  ;;  %v4561_v22 = vld [vmem:[#allocation8 + $0x224] sm:$0xf]  ;;  %v3709_v26 = vld [vmem:[#allocation8 + $0x330] sm:$0xf0]  ;;  %v4584_v16 = vld [vmem:[#allocation8 + $0x2d4] sm:$0xf0] }
  0x91   : > { %1566 = vmatpush.bf16.msra.mxu2 %v3664_v28  ;;  %v3584_v24 = vor.u32 %v4561_v22, %v3581_v23  ;;  %v3712_v27 = vor.u32 %v4593_v25, %v3709_v26  ;;  %v4557_v28 = vld [vmem:[#allocation8 + $0x204] sm:$0xf]  ;;  %v3693_v32 = vld [vmem:[#allocation8 + $0x310] sm:$0xf0]  ;;  %v3795_v17 = vld [vmem:[#allocation8 + $0x3c8] sm:$0xf] }
  0x92   : > { %1579 = vmatpush.bf16.msra.mxu3 %v3792_v30  ;;  %v3696_v33 = vor.u32 %v4589_v31, %v3693_v32  ;;  %v4512_v22 = vld [vmem:[#allocation8 + $0x94] sm:$0xf0]  ;;  %v3507_v23 = vld [vmem:[#allocation8 + $0x188] sm:$0xf] }
  0x93   : > { %1541 = vmatpush.bf16.msra.mxu0 %v3392_v29  ;;  %v3565_v29 = vld [vmem:[#allocation8 + $0x210] sm:$0xf0]  ;;  %v4580_v31 = vld [vmem:[#allocation8 + $0x2b4] sm:$0xf0]  ;;  %v3459_v63 = vld [vmem:[#allocation8 + $0x128] sm:$0xf] }
  0x94   : > { %1554 = vmatpush.bf16.msra.mxu1 %v3520_v34  ;;  %v3568_v30 = vor.u32 %v4557_v28, %v3565_v29  ;;  %v479_v34 = vld [vmem:[#allocation7] sm:$0xf]  ;;  %v3796_v28 = vor.u32 %v4616_v20, %v3795_v17  ;;  %v4554_v17 = vld [vmem:[#allocation8 + $0x1ec] sm:$0xf] }
  0x95   : > { %1567 = vmatpush.bf16.msra.mxu2 %v3648_v40  ;;  %v481_v35 = vperm.slane %v479_v34, 0  ;;  %v482_v36 = vperm.slane %v479_v34, 1  ;;  %v3427_v40 = vld [vmem:[#allocation8 + $0xe8] sm:$0xf]  ;;  %v483_v47 = vperm.slane %v479_v34, 2  ;;  %v484_v50 = vperm.slane %v479_v34, 3 }
  0x96   : > { %1580 = vmatpush.bf16.msra.mxu3 %v3776_v42  ;;  %v4612_v34 = vld [vmem:[#allocation8 + $0x3b4] sm:$0xf0] }
  0x97   : > { %1542 = vmatpush.bf16.msra.mxu0 %v3376_v41  ;;  %v4524_v41 = vld [vmem:[#allocation8 + $0xf4] sm:$0xf0] }
  0x98   : > { %1555 = vmatpush.bf16.msra.mxu1 %v3504_v46  ;;  %v3428_v48 = vor.u32 %v4524_v41, %v3427_v40  ;;  %v3635_v41 = vld [vmem:[#allocation8 + $0x288] sm:$0xf] }
  0x99   : > { %1568 = vmatpush.bf16.msra.mxu2 %v3632_v52  ;;  %v3411_v52 = vld [vmem:[#allocation8 + $0xc8] sm:$0xf] }
  0x9a   : > { %1581 = vmatpush.bf16.msra.mxu3 %v3760_v54 }
  0x9b   : > { %1543 = vmatpush.bf16.msra.mxu0 %v3360_v53  ;;  %v4520_v53 = vld [vmem:[#allocation8 + $0xd4] sm:$0xf0] }
  0x9c   : > { %1556 = vmatpush.bf16.msra.mxu1 %v3488_v55  ;;  %v3539_v55 = vld [vmem:[#allocation8 + $0x1c8] sm:$0xf] }
  0x9d   : > { %1569 = vmatpush.bf16.msra.mxu2 %v3616_v1 }
  0x9e   : > { %1582 = vmatpush.bf16.msra.mxu3 %v3744_v3  ;;  %v3540_v3 = vor.u32 %v4552_v56, %v3539_v55  ;;  %v3619_v55 = vld [vmem:[#allocation8 + $0x268] sm:$0xf]  ;;  %v4572_v56 = vld [vmem:[#allocation8 + $0x274] sm:$0xf0] }
  0x9f   : > { %1544 = vmatpush.bf16.msra.mxu0 %v3344_v60 }
  0xa0   : > { %1557 = vmatpush.bf16.msra.mxu1 %v3472_v61  ;;  %v3412_v61 = vor.u32 %v4520_v53, %v3411_v52 }
  0xa1   : > { %1570 = vmatpush.bf16.msra.mxu2 %v3600_v13  ;;  %v3812_v13 = vor.u32 %v4620_v4, %v3811_v0  ;;  %v4532_v0 = vld [vmem:[#allocation8 + $0x134] sm:$0xf0] }
  0xa2   : > { %1583 = vmatpush.bf16.msra.mxu3 %v3728_v15  ;;  %v3667_v15 = vld [vmem:[#allocation8 + $0x2c8] sm:$0xf]  ;;  %v4568_v4 = vld [vmem:[#allocation8 + $0x254] sm:$0xf0] }
  0xa3   : > { %1545 = vmatpush.bf16.msra.mxu0 %v3328_v6  ;;  %v4516_v6 = vld [vmem:[#allocation8 + $0xb4] sm:$0xf0]  ;;  %v3668_v26 = vor.u32 %v4584_v16, %v3667_v15  ;;  %v3429_v16 = vld [vmem:[#allocation8 + $0xf8] sm:$0xf0] }
  0xa4   : > { %1558 = vmatpush.bf16.msra.mxu1 %v3456_v9  ;;  %v4548_v9 = vld [vmem:[#allocation8 + $0x1b4] sm:$0xf0]  ;;  %v3396_v14 = vor.u32 %v4516_v6, %v3395_v5  ;;  %v3731_v5 = vld [vmem:[#allocation8 + $0x348] sm:$0xf] }
  0xa5   : > { %1571 = vmatpush.bf16.msra.mxu2 %v3584_v24  ;;  %v4544_v24 = vld [vmem:[#allocation8 + $0x194] sm:$0xf0] }
  0xa6   : > { %1584 = vmatpush.bf16.msra.mxu3 %v3712_v27  ;;  %v3508_v32 = vor.u32 %v4544_v24, %v3507_v23 }
  0xa7   : > { %1546 = vmatpush.bf16.msra.mxu0 %v3312_v19  ;;  %v3524_v19 = vor.u32 %v4548_v9, %v3523_v8  ;;  %v4600_v8 = vld [vmem:[#allocation8 + $0x354] sm:$0xf0]  ;;  %v3315_v9 = vld [vmem:[#allocation8 + $0x8] sm:$0xf] }
  0xa8   : > { %1559 = vmatpush.bf16.msra.mxu1 %v3440_v21  ;;  %v3379_v21 = vld [vmem:[#allocation8 + $0x88] sm:$0xf]  ;;  %v3732_v20 = vor.u32 %v4600_v8, %v3731_v5  ;;  %v3781_v8 = vld [vmem:[#allocation8 + $0x3b8] sm:$0xf0] }
  0xa9   : > { %1572 = vmatpush.bf16.msra.mxu2 %v3568_v30  ;;  %v3380_v29 = vor.u32 %v4512_v22, %v3379_v21  ;;  %v3651_v30 = vld [vmem:[#allocation8 + $0x2a8] sm:$0xf]  ;;  %v4564_v22 = vld [vmem:[#allocation8 + $0x234] sm:$0xf0] }
  0xaa   : > { %1585 = vmatpush.bf16.msra.mxu3 %v3696_v33  ;;  %v3779_v33 = vld [vmem:[#allocation8 + $0x3a8] sm:$0xf] }
  0xab   : > { %v3780_v40 = vor.u32 %v4612_v34, %v3779_v33  ;;  %v3587_v21 = vld [vmem:[#allocation8 + $0x228] sm:$0xf]  ;;  %v3541_v33 = vld [vmem:[#allocation8 + $0x1d8] sm:$0xf0] }
  0xe7   : > { %v658_v37 = vpop.f32.mrf.mxu0 }
  0xe8   : > { %v659_v38 = vadd.f32 %v658_v37, %v481_v35  ;;  %v671_v39 = vpop.f32.mrf.mxu1  ;;  %v3363_v35 = vld [vmem:[#allocation8 + $0x68] sm:$0xf] }
  0xe9   : > { %v672_v42 = vadd.f32 %v671_v39, %v482_v36  ;;  %v4508_v36 = vld [vmem:[#allocation8 + $0x74] sm:$0xf0]  ;;  %v3491_v37 = vld [vmem:[#allocation8 + $0x168] sm:$0xf]  ;;  %v3652_v39 = vor.u32 %v4580_v31, %v3651_v30  ;;  %v3588_v30 = vor.u32 %v4564_v22, %v3587_v21  ;;  %v3413_v31 = vld [vmem:[#allocation8 + $0xd8] sm:$0xf0] }
  0xea   : > { %v701_v45 = vmax.f32 %v659_v38, 0.0  ;;  %v4540_v38 = vld [vmem:[#allocation8 + $0x174] sm:$0xf0]  ;;  %v3364_v43 = vor.u32 %v4508_v36, %v3363_v35  ;;  %v3571_v35 = vld [vmem:[#allocation8 + $0x208] sm:$0xf] }
  0xeb   : > { %v702_v46 = vmax.f32 %v672_v42, 0.0  ;;  %v4576_v42 = vld [vmem:[#allocation8 + $0x294] sm:$0xf0]  ;;  %v3492_v44 = vor.u32 %v4540_v38, %v3491_v37  ;;  %v3699_v37 = vld [vmem:[#allocation8 + $0x308] sm:$0xf] }
  0xec   : > { %v5398_v49 = vpack.c.bf16 %v701_v45, %v701_v45  ;;  %v3763_v45 = vld [vmem:[#allocation8 + $0x388] sm:$0xf]  ;;  %v3636_v52 = vor.u32 %v4576_v42, %v3635_v41  ;;  %v4560_v36 = vld [vmem:[#allocation8 + $0x214] sm:$0xf0]  ;;  %v4606_v21 = vld [vmem:[#allocation8 + $0x38c] sm:$0xf] }
  0xed   : > { %v5400_v54 = vpack.c.bf16 %v702_v46, %v702_v46  ;;  %v4608_v46 = vld [vmem:[#allocation8 + $0x394] sm:$0xf0]  ;;  %v3765_v22 = vld [vmem:[#allocation8 + $0x398] sm:$0xf0] }
  0xee   : > { %1495 = vmatmul.bf16.vlgmr.msrb.gmra.mxu0 %v5398_v49  ;;  %v3764_v53 = vor.u32 %v4608_v46, %v3763_v45  ;;  %v4592_v38 = vld [vmem:[#allocation8 + $0x314] sm:$0xf0]  ;;  %v4514_v45 = vld [vmem:[#allocation8 + $0xac] sm:$0xf]  ;;  %v3572_v46 = vor.u32 %v4560_v36, %v3571_v35  ;;  %v3333_v36 = vld [vmem:[#allocation8 + $0x38] sm:$0xf0] }
  0xef   : > { %v684_v57 = vpop.f32.mrf.mxu2  ;;  %1508 = vmatmul.bf16.vlgmr.msrb.gmra.mxu1 %v5400_v54  ;;  %1591 = vmatpush.bf16.msrb.mxu0 %v3428_v48  ;;  %v660_v60 = vpop.f32.mrf.mxu0  ;;  %v4504_v48 = vld [vmem:[#allocation8 + $0x54] sm:$0xf0]  ;;  %v4498_v35 = vld [vmem:[#allocation8 + $0x2c] sm:$0xf] }
  0xf0   : > { %v685_v58 = vadd.f32 %v684_v57, %v483_v47  ;;  %v697_v59 = vpop.f32.mrf.mxu3  ;;  %1604 = vmatpush.bf16.msrb.mxu1 %v3556_v51  ;;  %v673_v2 = vpop.f32.mrf.mxu1  ;;  %v3347_v47 = vld [vmem:[#allocation8 + $0x48] sm:$0xf]  ;;  %v4536_v51 = vld [vmem:[#allocation8 + $0x154] sm:$0xf0] }
  0xf1   : > { %v698_v1 = vadd.f32 %v697_v59, %v484_v50  ;;  %v3475_v50 = vld [vmem:[#allocation8 + $0x148] sm:$0xf]  ;;  %v3348_v57 = vor.u32 %v4504_v48, %v3347_v47  ;;  %v4604_v60 = vld [vmem:[#allocation8 + $0x374] sm:$0xf0]  ;;  %v3397_v47 = vld [vmem:[#allocation8 + $0xb8] sm:$0xf0] }
  0xf2   : > { %v703_v7 = vmax.f32 %v685_v58, 0.0  ;;  %v3476_v58 = vor.u32 %v4536_v51, %v3475_v50  ;;  %v3747_v59 = vld [vmem:[#allocation8 + $0x368] sm:$0xf]  ;;  %v4546_v48 = vld [vmem:[#allocation8 + $0x1ac] sm:$0xf]  ;;  %v3700_v51 = vor.u32 %v4592_v38, %v3699_v37 }
  0xf3   : > { %v704_v10 = vmax.f32 %v698_v1, 0.0  ;;  %1592 = vmatpush.bf16.msrb.mxu0 %v3412_v61  ;;  %v3331_v61 = vld [vmem:[#allocation8 + $0x28] sm:$0xf]  ;;  %v3620_v1 = vor.u32 %v4572_v56, %v3619_v55  ;;  %v3748_v2 = vor.u32 %v4604_v60, %v3747_v59  ;;  %v3525_v50 = vld [vmem:[#allocation8 + $0x1b8] sm:$0xf0] }
  0xf4   : > { %v5404_v12 = vpack.c.bf16 %v703_v7, %v703_v7  ;;  %1605 = vmatpush.bf16.msrb.mxu1 %v3540_v3  ;;  %v3603_v3 = vld [vmem:[#allocation8 + $0x248] sm:$0xf]  ;;  %v3332_v6 = vor.u32 %v4500_v62, %v3331_v61  ;;  %v3460_v7 = vor.u32 %v4532_v0, %v3459_v63  ;;  %v4582_v55 = vld [vmem:[#allocation8 + $0x2cc] sm:$0xf]  ;;  %v3669_v56 = vld [vmem:[#allocation8 + $0x2d8] sm:$0xf0] }
  0xf5   : > { %v5406_v18 = vpack.c.bf16 %v704_v10, %v704_v10  ;;  %v4496_v10 = vld [vmem:[#allocation8 + $0x14] sm:$0xf0]  ;;  %v3604_v15 = vor.u32 %v4568_v4, %v3603_v3  ;;  %v4614_v59 = vld [vmem:[#allocation8 + $0x3cc] sm:$0xf]  ;;  %v3797_v60 = vld [vmem:[#allocation8 + $0x3d8] sm:$0xf0] }
  0xf6   : > { %1521 = vmatmul.bf16.vlgmr.msrb.gmra.mxu2 %v5404_v12  ;;  %v3316_v23 = vor.u32 %v4496_v10, %v3315_v9  ;;  %v4510_v61 = vld [vmem:[#allocation8 + $0x8c] sm:$0xf]  ;;  %v3381_v62 = vld [vmem:[#allocation8 + $0x98] sm:$0xf0] }
  0xf7   : > { %1534 = vmatmul.bf16.vlgmr.msrb.gmra.mxu3 %v5406_v18  ;;  %1617 = vmatpush.bf16.msrb.mxu2 %v3684_v11  ;;  %v686_v25 = vpop.f32.mrf.mxu2  ;;  %v3443_v11 = vld [vmem:[#allocation8 + $0x108] sm:$0xf]  ;;  %v4542_v63 = vld [vmem:[#allocation8 + $0x18c] sm:$0xf]  ;;  %v3509_v0 = vld [vmem:[#allocation8 + $0x198] sm:$0xf0]  ;;  %v3384_v5 = vor.u32 %v4510_v61, %v3381_v62 }
  0xf8   : > { %1630 = vmatpush.bf16.msrb.mxu3 %v3812_v13  ;;  %v699_v27 = vpop.f32.mrf.mxu3  ;;  %1593 = vmatpush.bf16.msrb.mxu0 %v3396_v14  ;;  %v4528_v13 = vld [vmem:[#allocation8 + $0x114] sm:$0xf0]  ;;  %v4522_v14 = vld [vmem:[#allocation8 + $0xec] sm:$0xf]  ;;  %v3715_v25 = vld [vmem:[#allocation8 + $0x328] sm:$0xf] }
  0xf9   : > { %1606 = vmatpush.bf16.msrb.mxu1 %v3524_v19  ;;  %v3557_v19 = vld [vmem:[#allocation8 + $0x1f8] sm:$0xf0]  ;;  %v3444_v24 = vor.u32 %v4528_v13, %v3443_v11  ;;  %v3432_v27 = vor.u32 %v4522_v14, %v3429_v16  ;;  %v4578_v3 = vld [vmem:[#allocation8 + $0x2ac] sm:$0xf] }
  0xfa   : > { %v3653_v4 = vld [vmem:[#allocation8 + $0x2b8] sm:$0xf0]  ;;  %v4506_v9 = vld [vmem:[#allocation8 + $0x6c] sm:$0xf] }
  0xfb   : > { %1618 = vmatpush.bf16.msrb.mxu2 %v3668_v26  ;;  %v4596_v26 = vld [vmem:[#allocation8 + $0x334] sm:$0xf0]  ;;  %v3365_v10 = vld [vmem:[#allocation8 + $0x78] sm:$0xf0]  ;;  %v4538_v11 = vld [vmem:[#allocation8 + $0x16c] sm:$0xf]  ;;  %v3656_v14 = vor.u32 %v4578_v3, %v3653_v4 }
  0xfc   : > { %1631 = vmatpush.bf16.msrb.mxu3 %v3796_v28  ;;  %1594 = vmatpush.bf16.msrb.mxu0 %v3380_v29  ;;  %v3560_v28 = vor.u32 %v4554_v17, %v3557_v19  ;;  %v4518_v29 = vld [vmem:[#allocation8 + $0xcc] sm:$0xf]  ;;  %v3716_v34 = vor.u32 %v4596_v26, %v3715_v25  ;;  %v3493_v13 = vld [vmem:[#allocation8 + $0x178] sm:$0xf0]  ;;  %v3368_v19 = vor.u32 %v4506_v9, %v3365_v10 }
  0xfd   : > { %1607 = vmatpush.bf16.msrb.mxu1 %v3508_v32  ;;  %v4550_v32 = vld [vmem:[#allocation8 + $0x1cc] sm:$0xf]  ;;  %v3416_v41 = vor.u32 %v4518_v29, %v3413_v31  ;;  %v3637_v17 = vld [vmem:[#allocation8 + $0x298] sm:$0xf0] }
  0xfe   : > { %1547 = vmatmul.bf16.vlgmr.msra.gmra.mxu0 %v5398_v49  ;;  %v3544_v42 = vor.u32 %v4550_v32, %v3541_v33  ;;  %v4574_v16 = vld [vmem:[#allocation8 + $0x28c] sm:$0xf]  ;;  %v3477_v26 = vld [vmem:[#allocation8 + $0x158] sm:$0xf0] }
  0xff   : > { %1619 = vmatpush.bf16.msrb.mxu2 %v3652_v39  ;;  %1560 = vmatmul.bf16.vlgmr.msra.gmra.mxu1 %v5400_v54  ;;  %v4586_v39 = vld [vmem:[#allocation8 + $0x2ec] sm:$0xf]  ;;  %v3461_v38 = vld [vmem:[#allocation8 + $0x138] sm:$0xf0] }
 0x100   : > { %1632 = vmatpush.bf16.msrb.mxu3 %v3780_v40  ;;  %1595 = vmatpush.bf16.msrb.mxu0 %v3364_v43  ;;  %v3685_v40 = vld [vmem:[#allocation8 + $0x2f8] sm:$0xf0]  ;;  %v4618_v43 = vld [vmem:[#allocation8 + $0x3ec] sm:$0xf] }
 0x101   : > { %1608 = vmatpush.bf16.msrb.mxu1 %v3492_v44  ;;  %v3813_v44 = vld [vmem:[#allocation8 + $0x3f8] sm:$0xf0]  ;;  %v4534_v25 = vld [vmem:[#allocation8 + $0x14c] sm:$0xf] }
 0x102   : > { %v4570_v29 = vld [vmem:[#allocation8 + $0x26c] sm:$0xf]  ;;  %v3480_v32 = vor.u32 %v4534_v25, %v3477_v26  ;;  %v3573_v10 = vld [vmem:[#allocation8 + $0x218] sm:$0xf0]  ;;  %v4171_v26 = vld [vmem:[#allocation11 + $0x2c0] sm:$0xf] }
 0x103   : > { %1620 = vmatpush.bf16.msrb.mxu2 %v3636_v52  ;;  %v3688_v52 = vor.u32 %v4586_v39, %v3685_v40  ;;  %v4602_v33 = vld [vmem:[#allocation8 + $0x36c] sm:$0xf] }
 0x104   : > { %1633 = vmatpush.bf16.msrb.mxu3 %v3764_v53  ;;  %1596 = vmatpush.bf16.msrb.mxu0 %v3348_v57  ;;  %v3816_v53 = vor.u32 %v4618_v43, %v3813_v44  ;;  %v3400_v57 = vor.u32 %v4514_v45, %v3397_v47  ;;  %v4530_v37 = vld [vmem:[#allocation8 + $0x12c] sm:$0xf]  ;;  %v3336_v44 = vor.u32 %v4498_v35, %v3333_v36  ;;  %v4635_v35 = vld [vmem:[#allocation11 + $0x6c] sm:$0xf0] }
 0x105   : > { %1609 = vmatpush.bf16.msrb.mxu1 %v3476_v58  ;;  %v3528_v58 = vor.u32 %v4546_v48, %v3525_v50  ;;  %v4598_v43 = vld [vmem:[#allocation8 + $0x34c] sm:$0xf]  ;;  %v3464_v45 = vor.u32 %v4530_v37, %v3461_v38  ;;  %v3317_v48 = vld [vmem:[#allocation8 + $0x18] sm:$0xf0]  ;;  %v3995_v37 = vld [vmem:[#allocation11 + $0x160] sm:$0xf] }
 0x106   : > { %1573 = vmatmul.bf16.vlgmr.msra.gmra.mxu2 %v5404_v12  ;;  %v4494_v47 = vld [vmem:[#allocation8 + $0xc] sm:$0xf]  ;;  %v4667_v38 = vld [vmem:[#allocation11 + $0x16c] sm:$0xf0] }
 0x107   : > { %1586 = vmatmul.bf16.vlgmr.msra.gmra.mxu3 %v5406_v18  ;;  %1621 = vmatpush.bf16.msrb.mxu2 %v3620_v1  ;;  %v3672_v1 = vor.u32 %v4582_v55, %v3669_v56  ;;  %v4526_v50 = vld [vmem:[#allocation8 + $0x10c] sm:$0xf]  ;;  %v4651_v55 = vld [vmem:[#allocation11 + $0xec] sm:$0xf0]  ;;  %v4059_v56 = vld [vmem:[#allocation11 + $0x1e0] sm:$0xf]  ;;  %v3320_v61 = vor.u32 %v4494_v47, %v3317_v48 }
 0x108   : > { %1634 = vmatpush.bf16.msrb.mxu3 %v3748_v2  ;;  %1597 = vmatpush.bf16.msrb.mxu0 %v3332_v6  ;;  %v3800_v2 = vor.u32 %v4614_v59, %v3797_v60  ;;  %v3512_v6 = vor.u32 %v4542_v63, %v3509_v0  ;;  %v4562_v59 = vld [vmem:[#allocation8 + $0x22c] sm:$0xf]  ;;  %v3589_v60 = vld [vmem:[#allocation8 + $0x238] sm:$0xf0]  ;;  %v3819_v48 = vld [vmem:[#allocation11] sm:$0xf] }
 0x109   : > { %1610 = vmatpush.bf16.msrb.mxu1 %v3460_v7  ;;  %v4610_v7 = vld [vmem:[#allocation8 + $0x3ac] sm:$0xf]  ;;  %v3717_v0 = vld [vmem:[#allocation8 + $0x338] sm:$0xf0]  ;;  %v3592_v4 = vor.u32 %v4562_v59, %v3589_v60  ;;  %v4641_v59 = vld [vmem:[#allocation11 + $0xa4] sm:$0xf] }
 0x10a   : > { %v4594_v63 = vld [vmem:[#allocation8 + $0x32c] sm:$0xf]  ;;  %v3901_v60 = vld [vmem:[#allocation11 + $0xb0] sm:$0xf0] }
 0x10b   : > { %1622 = vmatpush.bf16.msrb.mxu2 %v3604_v15  ;;  %v3784_v15 = vor.u32 %v4610_v7, %v3781_v8  ;;  %v4679_v7 = vld [vmem:[#allocation11 + $0x1cc] sm:$0xf0]  ;;  %v3720_v8 = vor.u32 %v4594_v63, %v3717_v0  ;;  %v4558_v9 = vld [vmem:[#allocation8 + $0x20c] sm:$0xf]  ;;  %v4155_v0 = vld [vmem:[#allocation11 + $0x2a0] sm:$0xf] }
 0x10c   : > { %1635 = vmatpush.bf16.msrb.mxu3 %v3732_v20  ;;  %1598 = vmatpush.bf16.msrb.mxu0 %v3316_v23  ;;  %v3496_v20 = vor.u32 %v4538_v11, %v3493_v13  ;;  %v4502_v23 = vld [vmem:[#allocation8 + $0x4c] sm:$0xf]  ;;  %v3701_v13 = vld [vmem:[#allocation8 + $0x318] sm:$0xf0]  ;;  %v4659_v63 = vld [vmem:[#allocation11 + $0x12c] sm:$0xf0] }
 0x10d   : > { %1611 = vmatpush.bf16.msrb.mxu1 %v3444_v24  ;;  %v3349_v24 = vld [vmem:[#allocation8 + $0x58] sm:$0xf0]  ;;  %v4590_v11 = vld [vmem:[#allocation8 + $0x30c] sm:$0xf] }
 0x10e   : > { %v3352_v31 = vor.u32 %v4502_v23, %v3349_v24  ;;  %v4027_v23 = vld [vmem:[#allocation11 + $0x1a0] sm:$0xf]  ;;  %v4675_v24 = vld [vmem:[#allocation11 + $0x1ac] sm:$0xf0] }
 0x10f   : > { %1623 = vmatpush.bf16.msrb.mxu2 %v3588_v30  ;;  %1599 = vmatmul.bf16.vlgmr.msrb.gmra.mxu0 %v5398_v49  ;;  %v3621_v30 = vld [vmem:[#allocation8 + $0x278] sm:$0xf0] }
 0x110   : > { %1643 = vmatpush.bf16.msra.mxu0 %v3432_v27  ;;  %1636 = vmatpush.bf16.msrb.mxu3 %v3716_v34  ;;  %v3640_v27 = vor.u32 %v4574_v16, %v3637_v17  ;;  %v3749_v34 = vld [vmem:[#allocation8 + $0x378] sm:$0xf0]  ;;  %v3624_v39 = vor.u32 %v4570_v29, %v3621_v30  ;;  %v3883_v29 = vld [vmem:[#allocation11 + $0x80] sm:$0xf]  ;;  %v4639_v30 = vld [vmem:[#allocation11 + $0x8c] sm:$0xf0] }
 0x111   : > { %1656 = vmatpush.bf16.msra.mxu1 %v3560_v28  ;;  %v3768_v28 = vor.u32 %v4606_v21, %v3765_v22  ;;  %v3752_v40 = vor.u32 %v4602_v33, %v3749_v34  ;;  %v4643_v21 = vld [vmem:[#allocation11 + $0xac] sm:$0xf0]  ;;  %v3704_v22 = vor.u32 %v4590_v11, %v3701_v13  ;;  %v3884_v34 = vor.u32 %v4639_v30, %v3883_v29  ;;  %v4107_v30 = vld [vmem:[#allocation11 + $0x240] sm:$0xf] }
 0x112   : > { %1612 = vmatmul.bf16.vlgmr.msrb.gmra.mxu1 %v5400_v54  ;;  %v4671_v33 = vld [vmem:[#allocation11 + $0x18c] sm:$0xf0] }
 0x113   : > { %1624 = vmatpush.bf16.msrb.mxu2 %v3572_v46  ;;  %v3733_v46 = vld [vmem:[#allocation8 + $0x358] sm:$0xf0]  ;;  %v4703_v11 = vld [vmem:[#allocation11 + $0x28c] sm:$0xf0] }
 0x114   : > { %1644 = vmatpush.bf16.msra.mxu0 %v3416_v41  ;;  %1637 = vmatpush.bf16.msrb.mxu3 %v3700_v51  ;;  %v4566_v41 = vld [vmem:[#allocation8 + $0x24c] sm:$0xf]  ;;  %v3445_v51 = vld [vmem:[#allocation8 + $0x118] sm:$0xf0] }
 0x115   : > { %1657 = vmatpush.bf16.msra.mxu1 %v3544_v42  ;;  %v3605_v42 = vld [vmem:[#allocation8 + $0x258] sm:$0xf0]  ;;  %v3448_v62 = vor.u32 %v4526_v50, %v3445_v51  ;;  %v4623_v50 = vld [vmem:[#allocation11 + $0xc] sm:$0xf0]  ;;  %v4649_v51 = vld [vmem:[#allocation11 + $0xe4] sm:$0xf] }
 0x116   : > { %1625 = vmatmul.bf16.vlgmr.msrb.gmra.mxu2 %v5404_v12 }
 0x117   : > { %1669 = vmatpush.bf16.msra.mxu2 %v3688_v52  ;;  %1638 = vmatmul.bf16.vlgmr.msrb.gmra.mxu3 %v5406_v18  ;;  %v3931_v52 = vld [vmem:[#allocation11 + $0xe0] sm:$0xf] }
 0x118   : > { %1682 = vmatpush.bf16.msra.mxu3 %v3816_v53  ;;  %1645 = vmatpush.bf16.msra.mxu0 %v3400_v57  ;;  %v3608_v53 = vor.u32 %v4566_v41, %v3605_v42  ;;  %v4683_v57 = vld [vmem:[#allocation11 + $0x1ec] sm:$0xf0]  ;;  %v3996_v42 = vor.u32 %v4667_v38, %v3995_v37  ;;  %v4091_v37 = vld [vmem:[#allocation11 + $0x220] sm:$0xf] }
 0x119   : > { %1658 = vmatpush.bf16.msra.mxu1 %v3528_v58  ;;  %v3736_v58 = vor.u32 %v4598_v43, %v3733_v46  ;;  %v4060_v3 = vor.u32 %v4683_v57, %v4059_v56  ;;  %v4631_v41 = vld [vmem:[#allocation11 + $0x4c] sm:$0xf0]  ;;  %v3979_v43 = vld [vmem:[#allocation11 + $0x140] sm:$0xf]  ;;  %v4645_v56 = vld [vmem:[#allocation11 + $0xc4] sm:$0xf] }
 0x11a   : > { %v4627_v46 = vld [vmem:[#allocation11 + $0x2c] sm:$0xf0]  ;;  %v3917_v57 = vld [vmem:[#allocation11 + $0xd0] sm:$0xf0] }
 0x11b   : > { %1670 = vmatpush.bf16.msra.mxu2 %v3672_v1  ;;  %v3932_v1 = vor.u32 %v4651_v55, %v3931_v52  ;;  %v3933_v52 = vld [vmem:[#allocation11 + $0xf0] sm:$0xf0]  ;;  %v4691_v38 = vld [vmem:[#allocation11 + $0x22c] sm:$0xf0] }
 0x11c   : > { %1683 = vmatpush.bf16.msra.mxu3 %v3800_v2  ;;  %1646 = vmatpush.bf16.msra.mxu0 %v3384_v5  ;;  %v3915_v2 = vld [vmem:[#allocation11 + $0xc0] sm:$0xf]  ;;  %v4647_v5 = vld [vmem:[#allocation11 + $0xcc] sm:$0xf0]  ;;  %v3936_v55 = vor.u32 %v4649_v51, %v3933_v52  ;;  %v3997_v51 = vld [vmem:[#allocation11 + $0x170] sm:$0xf0] }
 0x11d   : > { %1659 = vmatpush.bf16.msra.mxu1 %v3512_v6  ;;  %v4043_v6 = vld [vmem:[#allocation11 + $0x1c0] sm:$0xf]  ;;  %v3916_v16 = vor.u32 %v4647_v5, %v3915_v2  ;;  %v4707_v2 = vld [vmem:[#allocation11 + $0x2ac] sm:$0xf0] }
 0x11e   : > { %v4044_v17 = vor.u32 %v4679_v7, %v4043_v6  ;;  %v4156_v5 = vor.u32 %v4707_v2, %v4155_v0  ;;  %v3947_v7 = vld [vmem:[#allocation11 + $0x100] sm:$0xf] }
 0x11f   : > { %1671 = vmatpush.bf16.msra.mxu2 %v3656_v14  ;;  %v4187_v14 = vld [vmem:[#allocation11 + $0x2e0] sm:$0xf] }
 0x120   : > { %1684 = vmatpush.bf16.msra.mxu3 %v3784_v15  ;;  %1647 = vmatpush.bf16.msra.mxu0 %v3368_v19  ;;  %v4715_v15 = vld [vmem:[#allocation11 + $0x2ec] sm:$0xf0]  ;;  %v3576_v19 = vor.u32 %v4558_v9, %v3573_v10  ;;  %v4139_v9 = vld [vmem:[#allocation11 + $0x280] sm:$0xf] }
 0x121   : > { %1660 = vmatpush.bf16.msra.mxu1 %v3496_v20  ;;  %v3899_v20 = vld [vmem:[#allocation11 + $0xa0] sm:$0xf]  ;;  %v4188_v25 = vor.u32 %v4715_v15, %v4187_v14  ;;  %v4140_v13 = vor.u32 %v4703_v11, %v4139_v9  ;;  %v4633_v14 = vld [vmem:[#allocation11 + $0x64] sm:$0xf]  ;;  %v3869_v15 = vld [vmem:[#allocation11 + $0x70] sm:$0xf0] }
 0x122   : > { %v3965_v9 = vld [vmem:[#allocation11 + $0x130] sm:$0xf0] }
 0x123   : > { %1672 = vmatpush.bf16.msra.mxu2 %v3640_v27  ;;  %v4711_v27 = vld [vmem:[#allocation11 + $0x2cc] sm:$0xf0] }
 0x124   : > { %1685 = vmatpush.bf16.msra.mxu3 %v3768_v28  ;;  %1648 = vmatpush.bf16.msra.mxu0 %v3352_v31  ;;  %v3900_v28 = vor.u32 %v4643_v21, %v3899_v20  ;;  %v4028_v31 = vor.u32 %v4675_v24, %v4027_v23  ;;  %v4123_v20 = vld [vmem:[#allocation11 + $0x260] sm:$0xf]  ;;  %v4699_v21 = vld [vmem:[#allocation11 + $0x26c] sm:$0xf0]  ;;  %v4629_v24 = vld [vmem:[#allocation11 + $0x44] sm:$0xf] }
 0x125   : > { %1661 = vmatpush.bf16.msra.mxu1 %v3480_v32  ;;  %v4011_v32 = vld [vmem:[#allocation11 + $0x180] sm:$0xf]  ;;  %v4124_v23 = vor.u32 %v4699_v21, %v4123_v20  ;;  %v4653_v21 = vld [vmem:[#allocation11 + $0x104] sm:$0xf] }
 0x126   : > { %v4012_v36 = vor.u32 %v4671_v33, %v4011_v32  ;;  %v4625_v33 = vld [vmem:[#allocation11 + $0x24] sm:$0xf] }
 0x127   : > { %1673 = vmatpush.bf16.msra.mxu2 %v3624_v39 }
 0x128   : > { %1686 = vmatpush.bf16.msra.mxu3 %v3752_v40  ;;  %1649 = vmatpush.bf16.msra.mxu0 %v3336_v44  ;;  %v3851_v40 = vld [vmem:[#allocation11 + $0x40] sm:$0xf]  ;;  %v4663_v44 = vld [vmem:[#allocation11 + $0x14c] sm:$0xf0] }
 0x129   : > { %1662 = vmatpush.bf16.msra.mxu1 %v3464_v45  ;;  %v3835_v45 = vld [vmem:[#allocation11 + $0x20] sm:$0xf] }
 0x12a   : > { %v3836_v47 = vor.u32 %v4627_v46, %v3835_v45  ;;  %v4075_v45 = vld [vmem:[#allocation11 + $0x200] sm:$0xf]  ;;  %v4687_v46 = vld [vmem:[#allocation11 + $0x20c] sm:$0xf0] }
 0x12b   : > { %1674 = vmatpush.bf16.msra.mxu2 %v3608_v53  ;;  %v3820_v53 = vor.u32 %v4623_v50, %v3819_v48  ;;  %v4747_v48 = vld [vmem:[#allocation11 + $0x3ec] sm:$0xf0]  ;;  %v4665_v50 = vld [vmem:[#allocation11 + $0x164] sm:$0xf] }
 0x12c   : > { %1687 = vmatpush.bf16.msra.mxu3 %v3736_v58  ;;  %1650 = vmatpush.bf16.msra.mxu0 %v3320_v61  ;;  %v3920_v58 = vor.u32 %v4645_v56, %v3917_v57  ;;  %v3904_v61 = vor.u32 %v4641_v59, %v3901_v60  ;;  %v4189_v56 = vld [vmem:[#allocation11 + $0x2f0] sm:$0xf0]  ;;  %v4743_v59 = vld [vmem:[#allocation11 + $0x3cc] sm:$0xf0] }
 0x12d   : > { %1663 = vmatpush.bf16.msra.mxu1 %v3448_v62  ;;  %v3963_v62 = vld [vmem:[#allocation11 + $0x120] sm:$0xf] }
 0x12f   : > { %1675 = vmatpush.bf16.msra.mxu2 %v3592_v4  ;;  %1651 = vmatmul.bf16.vlgmr.msra.gmra.mxu0 %v5398_v49  ;;  %v4172_v49 = vor.u32 %v4711_v27, %v4171_v26  ;;  %v3885_v4 = vld [vmem:[#allocation11 + $0x90] sm:$0xf0]  ;;  %v4677_v26 = vld [vmem:[#allocation11 + $0x1c4] sm:$0xf] }
 0x130   : > { %2481 = vmatpush.bf16.msrb.mxu0 %v3932_v1  ;;  %1688 = vmatpush.bf16.msra.mxu3 %v3720_v8  ;;  %v3964_v1 = vor.u32 %v4659_v63, %v3963_v62  ;;  %v4655_v8 = vld [vmem:[#allocation11 + $0x10c] sm:$0xf0]  ;;  %v3981_v62 = vld [vmem:[#allocation11 + $0x150] sm:$0xf0]  ;;  %v4709_v63 = vld [vmem:[#allocation11 + $0x2c4] sm:$0xf] }
 0x131   : > { %2494 = vmatpush.bf16.msrb.mxu1 %v4060_v3  ;;  %v4637_v3 = vld [vmem:[#allocation11 + $0x84] sm:$0xf]  ;;  %v3948_v10 = vor.u32 %v4655_v8, %v3947_v7 }
 0x132   : > { %1664 = vmatmul.bf16.vlgmr.msra.gmra.mxu1 %v5400_v54  ;;  %v3867_v54 = vld [vmem:[#allocation11 + $0x60] sm:$0xf]  ;;  %v3888_v6 = vor.u32 %v4637_v3, %v3885_v4  ;;  %v5422_v3 = vld [vmem:[#allocation10] sm:$0xf]  ;;  %v4657_v8 = vld [vmem:[#allocation11 + $0x124] sm:$0xf] }
 0x133   : > { %1676 = vmatpush.bf16.msra.mxu2 %v3576_v19  ;;  %v3868_v39 = vor.u32 %v4635_v35, %v3867_v54  ;;  %v4061_v19 = vld [vmem:[#allocation11 + $0x1f0] sm:$0xf0]  ;;  %v4283_v4 = vld [vmem:[#allocation11 + $0x3a0] sm:$0xf] }
 0x134   : > { %2482 = vmatpush.bf16.msrb.mxu0 %v3916_v16  ;;  %1689 = vmatpush.bf16.msra.mxu3 %v3704_v22  ;;  %v4681_v16 = vld [vmem:[#allocation11 + $0x1e4] sm:$0xf]  ;;  %v4029_v35 = vld [vmem:[#allocation11 + $0x1b0] sm:$0xf0] }
 0x135   : > { %2495 = vmatpush.bf16.msrb.mxu1 %v4044_v17  ;;  %v3872_v17 = vor.u32 %v4633_v14, %v3869_v15  ;;  %v4064_v22 = vor.u32 %v4681_v16, %v4061_v19  ;;  %v4157_v14 = vld [vmem:[#allocation11 + $0x2b0] sm:$0xf0]  ;;  %v839_v15 = vperm.slane %v5422_v3, 0  ;;  %v4735_v19 = vld [vmem:[#allocation11 + $0x38c] sm:$0xf0] }
 0x136   : > { %1677 = vmatmul.bf16.vlgmr.msra.gmra.mxu2 %v5404_v12  ;;  %v3852_v12 = vor.u32 %v4631_v41, %v3851_v40  ;;  %v4621_v40 = vld [vmem:[#allocation11 + $0x4] sm:$0xf]  ;;  %v3821_v41 = vld [vmem:[#allocation11 + $0x10] sm:$0xf0] }
 0x137   : > { %2507 = vmatpush.bf16.msrb.mxu2 %v4188_v25  ;;  %1690 = vmatmul.bf16.vlgmr.msra.gmra.mxu3 %v5406_v18  ;;  %v3980_v18 = vor.u32 %v4663_v44, %v3979_v43  ;;  %v3853_v25 = vld [vmem:[#allocation11 + $0x50] sm:$0xf0]  ;;  %v3824_v43 = vor.u32 %v4621_v40, %v3821_v41 }
 0x138   : > { %2483 = vmatpush.bf16.msrb.mxu0 %v3900_v28  ;;  %v3856_v27 = vor.u32 %v4629_v24, %v3853_v25  ;;  %v4045_v28 = vld [vmem:[#allocation11 + $0x1d0] sm:$0xf0] }
 0x139   : > { %2496 = vmatpush.bf16.msrb.mxu1 %v4028_v31  ;;  %v4048_v29 = vor.u32 %v4677_v26, %v4045_v28  ;;  %v4695_v31 = vld [vmem:[#allocation11 + $0x24c] sm:$0xf0]  ;;  %v4013_v44 = vld [vmem:[#allocation11 + $0x190] sm:$0xf0]  ;;  %v4251_v28 = vld [vmem:[#allocation11 + $0x360] sm:$0xf] }
 0x13a   : > { %v4108_v32 = vor.u32 %v4695_v31, %v4107_v30  ;;  %v4141_v25 = vld [vmem:[#allocation11 + $0x290] sm:$0xf0] }
 0x13b   : > { %2508 = vmatpush.bf16.msrb.mxu2 %v4172_v49  ;;  %v3837_v49 = vld [vmem:[#allocation11 + $0x30] sm:$0xf0] }
 0x13c   : > { %2484 = vmatpush.bf16.msrb.mxu0 %v3884_v34  ;;  %v4673_v34 = vld [vmem:[#allocation11 + $0x1a4] sm:$0xf]  ;;  %v3840_v54 = vor.u32 %v4625_v33, %v3837_v49  ;;  %v4125_v33 = vld [vmem:[#allocation11 + $0x270] sm:$0xf0] }
 0x13d   : > { %2497 = vmatpush.bf16.msrb.mxu1 %v4012_v36  ;;  %v4032_v36 = vor.u32 %v4673_v34, %v4029_v35  ;;  %v4235_v35 = vld [vmem:[#allocation11 + $0x340] sm:$0xf] }
 0x13f   : > { %2509 = vmatpush.bf16.msrb.mxu2 %v4156_v5  ;;  %v4739_v5 = vld [vmem:[#allocation11 + $0x3ac] sm:$0xf0] }
 0x140   : > { %2485 = vmatpush.bf16.msrb.mxu0 %v3868_v39  ;;  %v4092_v39 = vor.u32 %v4691_v38, %v4091_v37  ;;  %v4284_v7 = vor.u32 %v4739_v5, %v4283_v4  ;;  %v4693_v38 = vld [vmem:[#allocation11 + $0x244] sm:$0xf] }
 0x141   : > { %2498 = vmatpush.bf16.msrb.mxu1 %v3996_v42  ;;  %v4669_v42 = vld [vmem:[#allocation11 + $0x184] sm:$0xf] }
 0x143   : > { %2510 = vmatpush.bf16.msrb.mxu2 %v4140_v13  ;;  %v3968_v13 = vor.u32 %v4657_v8, %v3965_v9 }
 0x144   : > { %2486 = vmatpush.bf16.msrb.mxu0 %v3852_v12  ;;  %v4016_v12 = vor.u32 %v4669_v42, %v4013_v44  ;;  %v3939_v44 = vld [vmem:[#allocation11 + $0xe8] sm:$0xf] }
 0x145   : > { %2499 = vmatpush.bf16.msrb.mxu1 %v3980_v18  ;;  %v4315_v18 = vld [vmem:[#allocation11 + $0x3e0] sm:$0xf] }
 0x146   : > { %v4316_v52 = vor.u32 %v4747_v48, %v4315_v18 }
 0x147   : > { %2511 = vmatpush.bf16.msrb.mxu2 %v4124_v23  ;;  %v4701_v23 = vld [vmem:[#allocation11 + $0x284] sm:$0xf] }
 0x148   : > { %2487 = vmatpush.bf16.msrb.mxu0 %v3836_v47  ;;  %v4076_v47 = vor.u32 %v4687_v46, %v4075_v45  ;;  %2520 = vmatpush.bf16.msrb.mxu3 %v4316_v52  ;;  %v4723_v45 = vld [vmem:[#allocation11 + $0x32c] sm:$0xf0] }
 0x149   : > { %2500 = vmatpush.bf16.msrb.mxu1 %v3964_v1  ;;  %v4173_v1 = vld [vmem:[#allocation11 + $0x2d0] sm:$0xf0] }
 0x14a   : > { %v4176_v2 = vor.u32 %v4709_v63, %v4173_v1  ;;  %v4077_v1 = vld [vmem:[#allocation11 + $0x210] sm:$0xf0] }
 0x14b   : > { %2512 = vmatpush.bf16.msrb.mxu2 %v4108_v32  ;;  %v4697_v32 = vld [vmem:[#allocation11 + $0x264] sm:$0xf] }
 0x14c   : > { %2488 = vmatpush.bf16.msrb.mxu0 %v3820_v53  ;;  %v4000_v53 = vor.u32 %v4665_v50, %v3997_v51  ;;  %v4128_v34 = vor.u32 %v4697_v32, %v4125_v33  ;;  %v4689_v50 = vld [vmem:[#allocation11 + $0x224] sm:$0xf]  ;;  %v4093_v51 = vld [vmem:[#allocation11 + $0x230] sm:$0xf0]  ;;  %v4636_v32 = vld [vmem:[#allocation11 + $0x74] sm:$0xf0] }
 0x14d   : > { %2501 = vmatpush.bf16.msrb.mxu1 %v3948_v10  ;;  %v4705_v10 = vld [vmem:[#allocation11 + $0x2a4] sm:$0xf]  ;;  %v4067_v33 = vld [vmem:[#allocation11 + $0x1e8] sm:$0xf] }
 0x14e   : > { %v4160_v16 = vor.u32 %v4705_v10, %v4157_v14  ;;  %v3907_v10 = vld [vmem:[#allocation11 + $0xa8] sm:$0xf]  ;;  %v4644_v14 = vld [vmem:[#allocation11 + $0xb4] sm:$0xf0] }
 0x14f   : > { %2513 = vmatpush.bf16.msrb.mxu2 %v4092_v39  ;;  %v4109_v39 = vld [vmem:[#allocation11 + $0x250] sm:$0xf0] }
 0x150   : > { %2533 = vmatpush.bf16.msra.mxu0 %v3936_v55  ;;  %v4713_v55 = vld [vmem:[#allocation11 + $0x2e4] sm:$0xf]  ;;  %v4112_v41 = vor.u32 %v4693_v38, %v4109_v39 }
 0x151   : > { %2546 = vmatpush.bf16.msra.mxu1 %v4064_v22  ;;  %v4192_v57 = vor.u32 %v4713_v55, %v4189_v56  ;;  %v3949_v22 = vld [vmem:[#allocation11 + $0x110] sm:$0xf0]  ;;  %v840_v56 = vperm.slane %v5422_v3, 1 }
 0x152   : > { %v3952_v24 = vor.u32 %v4653_v21, %v3949_v22  ;;  %v3891_v21 = vld [vmem:[#allocation11 + $0x88] sm:$0xf] }
 0x153   : > { %2514 = vmatpush.bf16.msrb.mxu2 %v4076_v47  ;;  %v4652_v47 = vld [vmem:[#allocation11 + $0xf4] sm:$0xf0] }
 0x154   : > { %2534 = vmatpush.bf16.msra.mxu0 %v3920_v58  ;;  %v4299_v58 = vld [vmem:[#allocation11 + $0x3c0] sm:$0xf] }
 0x155   : > { %2547 = vmatpush.bf16.msra.mxu1 %v4048_v29  ;;  %v4300_v60 = vor.u32 %v4743_v59, %v4299_v58  ;;  %v4731_v29 = vld [vmem:[#allocation11 + $0x36c] sm:$0xf0]  ;;  %v3940_v58 = vor.u32 %v4652_v47, %v3939_v44  ;;  %v4648_v59 = vld [vmem:[#allocation11 + $0xd4] sm:$0xf0]  ;;  %v4051_v44 = vld [vmem:[#allocation11 + $0x1c8] sm:$0xf] }
 0x156   : > { %v4252_v31 = vor.u32 %v4731_v29, %v4251_v28  ;;  %v841_v47 = vperm.slane %v5422_v3, 2 }
 0x157   : > { %2559 = vmatpush.bf16.msra.mxu2 %v4192_v57  ;;  %2521 = vmatpush.bf16.msrb.mxu3 %v4300_v60  ;;  %v3923_v57 = vld [vmem:[#allocation11 + $0xc8] sm:$0xf]  ;;  %v4203_v60 = vld [vmem:[#allocation11 + $0x300] sm:$0xf] }
 0x158   : > { %2535 = vmatpush.bf16.msra.mxu0 %v3904_v61  ;;  %v4661_v61 = vld [vmem:[#allocation11 + $0x144] sm:$0xf]  ;;  %v3924_v9 = vor.u32 %v4648_v59, %v3923_v57  ;;  %v4035_v57 = vld [vmem:[#allocation11 + $0x1a8] sm:$0xf] }
 0x159   : > { %2548 = vmatpush.bf16.msra.mxu1 %v4032_v36  ;;  %v3984_v0 = vor.u32 %v4661_v61, %v3981_v62  ;;  %v4727_v36 = vld [vmem:[#allocation11 + $0x34c] sm:$0xf0]  ;;  %v4725_v59 = vld [vmem:[#allocation11 + $0x344] sm:$0xf] }
 0x15a   : > { %v4236_v37 = vor.u32 %v4727_v36, %v4235_v35  ;;  %v4719_v61 = vld [vmem:[#allocation11 + $0x30c] sm:$0xf0]  ;;  %v4269_v35 = vld [vmem:[#allocation11 + $0x390] sm:$0xf0] }
 0x15b   : > { %2560 = vmatpush.bf16.msra.mxu2 %v4176_v2  ;;  %2522 = vmatpush.bf16.msrb.mxu3 %v4284_v7  ;;  %v4204_v63 = vor.u32 %v4719_v61, %v4203_v60  ;;  %v4745_v2 = vld [vmem:[#allocation11 + $0x3e4] sm:$0xf]  ;;  %v4237_v60 = vld [vmem:[#allocation11 + $0x350] sm:$0xf0] }
 0x15c   : > { %2536 = vmatpush.bf16.msra.mxu0 %v3888_v6 }
 0x15d   : > { %2549 = vmatpush.bf16.msra.mxu1 %v4016_v12  ;;  %v4219_v12 = vld [vmem:[#allocation11 + $0x320] sm:$0xf] }
 0x15e   : > { %v4220_v48 = vor.u32 %v4723_v45, %v4219_v12  ;;  %v4680_v45 = vld [vmem:[#allocation11 + $0x1d4] sm:$0xf0] }
 0x15f   : > { %2561 = vmatpush.bf16.msra.mxu2 %v4160_v16  ;;  %v4301_v16 = vld [vmem:[#allocation11 + $0x3d0] sm:$0xf0] }
 0x160   : > { %2537 = vmatpush.bf16.msra.mxu0 %v3872_v17  ;;  %v4267_v17 = vld [vmem:[#allocation11 + $0x380] sm:$0xf] }
 0x161   : > { %2550 = vmatpush.bf16.msra.mxu1 %v4000_v53  ;;  %v4268_v20 = vor.u32 %v4735_v19, %v4267_v17  ;;  %v4096_v53 = vor.u32 %v4689_v50, %v4093_v51 }
 0x163   : > { %2523 = vmatpush.bf16.msrb.mxu3 %v4268_v20  ;;  %v3908_v20 = vor.u32 %v4644_v14, %v3907_v10  ;;  %v4221_v10 = vld [vmem:[#allocation11 + $0x330] sm:$0xf0]  ;;  %v3941_v14 = vld [vmem:[#allocation11 + $0xf8] sm:$0xf0] }
 0x164   : > { %2538 = vmatpush.bf16.msra.mxu0 %v3856_v27  ;;  %v4144_v27 = vor.u32 %v4701_v23, %v4141_v25  ;;  %v4640_v23 = vld [vmem:[#allocation11 + $0x94] sm:$0xf0]  ;;  %v4285_v25 = vld [vmem:[#allocation11 + $0x3b0] sm:$0xf0] }
 0x165   : > { %2551 = vmatpush.bf16.msra.mxu1 %v3984_v0  ;;  %v4685_v0 = vld [vmem:[#allocation11 + $0x204] sm:$0xf] }
 0x166   : > { %2562 = vmatpush.bf16.msra.mxu2 %v4144_v27  ;;  %v4080_v5 = vor.u32 %v4685_v0, %v4077_v1  ;;  %v4240_v0 = vor.u32 %v4725_v59, %v4237_v60  ;;  %v4147_v59 = vld [vmem:[#allocation11 + $0x288] sm:$0xf]  ;;  %v4704_v60 = vld [vmem:[#allocation11 + $0x294] sm:$0xf0] }
 0x167   : > { %2524 = vmatpush.bf16.msrb.mxu3 %v4252_v31  ;;  %v3875_v31 = vld [vmem:[#allocation11 + $0x68] sm:$0xf] }
 0x168   : > { %2539 = vmatpush.bf16.msra.mxu0 %v3840_v54 }
 0x169   : > { %2552 = vmatpush.bf16.msra.mxu1 %v3968_v13 }
 0x16a   : > { %2563 = vmatpush.bf16.msra.mxu2 %v4128_v34  ;;  %v4684_v34 = vld [vmem:[#allocation11 + $0x1f4] sm:$0xf0] }
 0x16b   : > { %v1496_v6 = vpop.f32.mrf.mxu0  ;;  %2525 = vmatpush.bf16.msrb.mxu3 %v4236_v37 }
 0x16c   : > { %2540 = vmatpush.bf16.msra.mxu0 %v3824_v43  ;;  %v1509_v11 = vpop.f32.mrf.mxu1  ;;  %v1497_v26 = vadd.f32 %v1496_v6, %v839_v15  ;;  %v4317_v6 = vld [vmem:[#allocation11 + $0x3f0] sm:$0xf0]  ;;  %v4741_v15 = vld [vmem:[#allocation11 + $0x3c4] sm:$0xf] }
 0x16d   : > { %2553 = vmatpush.bf16.msra.mxu1 %v3952_v24  ;;  %v4320_v8 = vor.u32 %v4745_v2, %v4317_v6  ;;  %v4304_v19 = vor.u32 %v4741_v15, %v4301_v16  ;;  %v4737_v24 = vld [vmem:[#allocation11 + $0x3a4] sm:$0xf]  ;;  %v4624_v6 = vld [vmem:[#allocation11 + $0x14] sm:$0xf0] }
 0x16e   : > { %v1510_v54 = vadd.f32 %v1509_v11, %v1497_v26  ;;  %2564 = vmatpush.bf16.msra.mxu2 %v4112_v41  ;;  %v4288_v27 = vor.u32 %v4737_v24, %v4285_v25  ;;  %v4068_v41 = vor.u32 %v4684_v34, %v4067_v33  ;;  %v4195_v25 = vld [vmem:[#allocation11 + $0x2e8] sm:$0xf] }
 0x16f   : > { %2526 = vmatpush.bf16.msrb.mxu3 %v4220_v48 }
 0x172   : > { %2565 = vmatpush.bf16.msra.mxu2 %v4096_v53  ;;  %v4052_v53 = vor.u32 %v4680_v45, %v4051_v44 }
 0x173   : > { %v1498_v30 = vpop.f32.mrf.mxu0  ;;  %2527 = vmatpush.bf16.msrb.mxu3 %v4204_v63 }
 0x174   : > { %v1511_v49 = vpop.f32.mrf.mxu1  ;;  %v3892_v30 = vor.u32 %v4640_v23, %v3891_v21  ;;  %v4668_v23 = vld [vmem:[#allocation11 + $0x174] sm:$0xf0] }
 0x176   : > { %2566 = vmatpush.bf16.msra.mxu2 %v4080_v5  ;;  %v3827_v5 = vld [vmem:[#allocation11 + $0x8] sm:$0xf] }
 0x177   : > { %2572 = vmatpush.bf16.msra.mxu3 %v4320_v8  ;;  %v4672_v8 = vld [vmem:[#allocation11 + $0x194] sm:$0xf0] }
 0x179   : > { %v1522_v40 = vpop.f32.mrf.mxu2 }
 0x17a   : > { %v1523_v42 = vadd.f32 %v1522_v40, %v1510_v54  ;;  %v1535_v43 = vpop.f32.mrf.mxu3  ;;  %v4733_v54 = vld [vmem:[#allocation11 + $0x384] sm:$0xf]  ;;  %v3876_v40 = vor.u32 %v4636_v32, %v3875_v31  ;;  %v3925_v31 = vld [vmem:[#allocation11 + $0xd8] sm:$0xf0] }
 0x17b   : > { %v1548_v18 = vpop.f32.mrf.mxu0  ;;  %2573 = vmatpush.bf16.msra.mxu3 %v4304_v19  ;;  %v4272_v37 = vor.u32 %v4733_v54, %v4269_v35  ;;  %v3987_v35 = vld [vmem:[#allocation11 + $0x148] sm:$0xf] }
 0x17c   : > { %v1536_v46 = vadd.f32 %v1535_v43, %v1523_v42  ;;  %v1561_v52 = vpop.f32.mrf.mxu1  ;;  %v1549_v11 = vadd.f32 %v1548_v18, %v840_v56  ;;  %v3859_v42 = vld [vmem:[#allocation11 + $0x48] sm:$0xf]  ;;  %v4632_v43 = vld [vmem:[#allocation11 + $0x54] sm:$0xf0]  ;;  %v4253_v18 = vld [vmem:[#allocation11 + $0x370] sm:$0xf0] }
 0x17d   : > { %v4628_v56 = vld [vmem:[#allocation11 + $0x34] sm:$0xf0] }
 0x17e   : > { %v1695_v55 = vmax.f32 %v1536_v46, 0.0  ;;  %v1562_v22 = vadd.f32 %v1561_v52, %v1549_v11  ;;  %v4729_v46 = vld [vmem:[#allocation11 + $0x364] sm:$0xf]  ;;  %v3860_v52 = vor.u32 %v4632_v43, %v3859_v42 }
 0x17f   : > { %2574 = vmatpush.bf16.msra.mxu3 %v4288_v27  ;;  %v4256_v50 = vor.u32 %v4729_v46, %v4253_v18  ;;  %v4205_v27 = vld [vmem:[#allocation11 + $0x310] sm:$0xf0]  ;;  %v3971_v18 = vld [vmem:[#allocation11 + $0x128] sm:$0xf] }
 0x180   : > { %v5426_v62 = vpack.c.bf16 %v1695_v55, %v1695_v55  ;;  %v3843_v55 = vld [vmem:[#allocation11 + $0x28] sm:$0xf] }
 0x181   : > { %v1524_v4 = vpop.f32.mrf.mxu2  ;;  %v3844_v2 = vor.u32 %v4628_v56, %v3843_v55 }
 0x182   : > { %v1537_v7 = vpop.f32.mrf.mxu3  ;;  %2489 = vmatmul.bf16.vlgmr.msrb.gmra.mxu0 %v5426_v62 }
 0x183   : > { %2585 = vmatpush.bf16.msrb.mxu0 %v3940_v58  ;;  %v1550_v13 = vpop.f32.mrf.mxu0  ;;  %2575 = vmatpush.bf16.msra.mxu3 %v4272_v37  ;;  %v4676_v58 = vld [vmem:[#allocation11 + $0x1b4] sm:$0xf0]  ;;  %v4019_v7 = vld [vmem:[#allocation11 + $0x188] sm:$0xf] }
 0x184   : > { %v1563_v17 = vpop.f32.mrf.mxu1  ;;  %v4036_v4 = vor.u32 %v4676_v58, %v4035_v57  ;;  %v4650_v13 = vld [vmem:[#allocation11 + $0xec] sm:$0xf]  ;;  %v4020_v21 = vor.u32 %v4672_v8, %v4019_v7  ;;  %v4179_v37 = vld [vmem:[#allocation11 + $0x2c8] sm:$0xf]  ;;  %v4656_v58 = vld [vmem:[#allocation11 + $0x114] sm:$0xf0]  ;;  %v4148_v7 = vor.u32 %v4704_v60, %v4147_v59 }
 0x185   : > { %v3944_v24 = vor.u32 %v4650_v13, %v3941_v14  ;;  %v3955_v57 = vld [vmem:[#allocation11 + $0x108] sm:$0xf]  ;;  %v4630_v13 = vld [vmem:[#allocation11 + $0x4c] sm:$0xf]  ;;  %v3861_v14 = vld [vmem:[#allocation11 + $0x58] sm:$0xf0] }
 0x186   : > { %v4307_v60 = vld [vmem:[#allocation11 + $0x3c8] sm:$0xf] }
 0x187   : > { %2586 = vmatpush.bf16.msrb.mxu0 %v3924_v9  ;;  %2576 = vmatpush.bf16.msra.mxu3 %v4256_v50  ;;  %v4721_v9 = vld [vmem:[#allocation11 + $0x324] sm:$0xf]  ;;  %v4708_v50 = vld [vmem:[#allocation11 + $0x2b4] sm:$0xf0] }
 0x188   : > { %v4224_v15 = vor.u32 %v4721_v9, %v4221_v10  ;;  %v4131_v9 = vld [vmem:[#allocation11 + $0x268] sm:$0xf] }
 0x189   : > { %v1574_v26 = vpop.f32.mrf.mxu2 }
 0x18a   : > { %v1575_v28 = vadd.f32 %v1574_v26, %v1562_v22  ;;  %v1587_v29 = vpop.f32.mrf.mxu3  ;;  %v4003_v22 = vld [vmem:[#allocation11 + $0x168] sm:$0xf]  ;;  %v4717_v26 = vld [vmem:[#allocation11 + $0x304] sm:$0xf] }
 0x18b   : > { %2587 = vmatpush.bf16.msrb.mxu0 %v3908_v20  ;;  %2577 = vmatpush.bf16.msra.mxu3 %v4240_v0  ;;  %v3828_v20 = vor.u32 %v4624_v6, %v3827_v5  ;;  %v4208_v32 = vor.u32 %v4717_v26, %v4205_v27  ;;  %v3956_v5 = vor.u32 %v4656_v58, %v3955_v57  ;;  %v842_v6 = vperm.slane %v5422_v3, 3  ;;  %v4674_v26 = vld [vmem:[#allocation11 + $0x1ac] sm:$0xf]  ;;  %v4037_v27 = vld [vmem:[#allocation11 + $0x1b8] sm:$0xf0] }
 0x18c   : > { %v1588_v49 = vadd.f32 %v1587_v29, %v1575_v28  ;;  %v1600_v36 = vpop.f32.mrf.mxu0  ;;  %v4716_v29 = vld [vmem:[#allocation11 + $0x2f4] sm:$0xf0] }
 0x18d   : > { %v1601_v61 = vadd.f32 %v1600_v36, %v841_v47  ;;  %v4196_v34 = vor.u32 %v4716_v29, %v4195_v25  ;;  %v4664_v36 = vld [vmem:[#allocation11 + $0x154] sm:$0xf0] }
 0x18e   : > { %v1696_v38 = vmax.f32 %v1588_v49, 0.0  ;;  %v4004_v49 = vor.u32 %v4668_v23, %v4003_v22  ;;  %v3988_v44 = vor.u32 %v4664_v36, %v3987_v35  ;;  %v4660_v47 = vld [vmem:[#allocation11 + $0x134] sm:$0xf0]  ;;  %v4626_v23 = vld [vmem:[#allocation11 + $0x2c] sm:$0xf] }
 0x18f   : > { %v1613_v39 = vpop.f32.mrf.mxu1  ;;  %2588 = vmatpush.bf16.msrb.mxu0 %v3892_v30  ;;  %2578 = vmatpush.bf16.msra.mxu3 %v4224_v15  ;;  %v4646_v30 = vld [vmem:[#allocation11 + $0xcc] sm:$0xf]  ;;  %v4696_v22 = vld [vmem:[#allocation11 + $0x254] sm:$0xf0] }
 0x190   : > { %v5429_v12 = vpack.c.bf16 %v1696_v38, %v1696_v38  ;;  %v1614_v11 = vadd.f32 %v1613_v39, %v1601_v61  ;;  %v3928_v54 = vor.u32 %v4646_v30, %v3925_v31  ;;  %v4712_v39 = vld [vmem:[#allocation11 + $0x2d4] sm:$0xf0]  ;;  %v4634_v61 = vld [vmem:[#allocation11 + $0x6c] sm:$0xf]  ;;  %v4099_v31 = vld [vmem:[#allocation11 + $0x228] sm:$0xf] }
 0x191   : > { %v1576_v48 = vpop.f32.mrf.mxu2  ;;  %v4180_v45 = vor.u32 %v4712_v39, %v4179_v37  ;;  %v4678_v15 = vld [vmem:[#allocation11 + $0x1cc] sm:$0xf]  ;;  %v4021_v37 = vld [vmem:[#allocation11 + $0x198] sm:$0xf0] }
 0x192   : > { %v1589_v51 = vpop.f32.mrf.mxu3  ;;  %2502 = vmatmul.bf16.vlgmr.msrb.gmra.mxu1 %v5429_v12  ;;  %2541 = vmatmul.bf16.vlgmr.msra.gmra.mxu0 %v5426_v62  ;;  %v4163_v48 = vld [vmem:[#allocation11 + $0x2a8] sm:$0xf]  ;;  %v4670_v36 = vld [vmem:[#allocation11 + $0x18c] sm:$0xf] }
 0x193   : > { %2589 = vmatpush.bf16.msrb.mxu0 %v3876_v40  ;;  %2598 = vmatpush.bf16.msrb.mxu1 %v4068_v41  ;;  %v4642_v40 = vld [vmem:[#allocation11 + $0xac] sm:$0xf]  ;;  %v3909_v41 = vld [vmem:[#allocation11 + $0xb8] sm:$0xf0]  ;;  %v4164_v55 = vor.u32 %v4708_v50, %v4163_v48 }
 0x194   : > { %v1602_v63 = vpop.f32.mrf.mxu0  ;;  %2579 = vmatpush.bf16.msra.mxu3 %v4208_v32  ;;  %v3912_v46 = vor.u32 %v4642_v40, %v3909_v41  ;;  %v4638_v51 = vld [vmem:[#allocation11 + $0x8c] sm:$0xf]  ;;  %v4005_v50 = vld [vmem:[#allocation11 + $0x178] sm:$0xf0] }
 0x195   : > { %v3877_v63 = vld [vmem:[#allocation11 + $0x78] sm:$0xf0]  ;;  %v4666_v48 = vld [vmem:[#allocation11 + $0x16c] sm:$0xf] }
 0x196   : > { %v3880_v8 = vor.u32 %v4634_v61, %v3877_v63  ;;  %v4008_v58 = vor.u32 %v4666_v48, %v4005_v50  ;;  %v4744_v61 = vld [vmem:[#allocation11 + $0x3d4] sm:$0xf0]  ;;  %v4662_v63 = vld [vmem:[#allocation11 + $0x14c] sm:$0xf]  ;;  %v4325_v48 = vld [vmem:[#allocation11 + $0x3f8] sm:$0xf0] }
 0x197   : > { %v1615_v1 = vpop.f32.mrf.mxu1  ;;  %2590 = vmatpush.bf16.msrb.mxu0 %v3860_v52  ;;  %2599 = vmatpush.bf16.msrb.mxu1 %v4052_v53  ;;  %v3893_v52 = vld [vmem:[#allocation11 + $0x98] sm:$0xf0]  ;;  %v3972_v53 = vor.u32 %v4660_v47, %v3971_v18  ;;  %v4323_v18 = vld [vmem:[#allocation11 + $0x3e8] sm:$0xf]  ;;  %v4748_v47 = vld [vmem:[#allocation11 + $0x3f4] sm:$0xf0] }
 0x198   : > { %v3896_v56 = vor.u32 %v4638_v51, %v3893_v52  ;;  %v4682_v1 = vld [vmem:[#allocation11 + $0x1ec] sm:$0xf]  ;;  %v4197_v52 = vld [vmem:[#allocation11 + $0x2f8] sm:$0xf0] }
 0x199   : > { %v1626_v16 = vpop.f32.mrf.mxu2  ;;  %v4714_v51 = vld [vmem:[#allocation11 + $0x2ec] sm:$0xf] }
 0x19a   : > { %v1639_v17 = vpop.f32.mrf.mxu3  ;;  %v1627_v19 = vadd.f32 %v1626_v16, %v1614_v11  ;;  %v4700_v11 = vld [vmem:[#allocation11 + $0x274] sm:$0xf0]  ;;  %v4053_v16 = vld [vmem:[#allocation11 + $0x1d8] sm:$0xf0]  ;;  %v4200_v59 = vor.u32 %v4714_v51, %v4197_v52  ;;  %v4742_v52 = vld [vmem:[#allocation11 + $0x3cc] sm:$0xf] }
 0x19b   : > { %2591 = vmatpush.bf16.msrb.mxu0 %v3844_v2  ;;  %2600 = vmatpush.bf16.msrb.mxu1 %v4036_v4  ;;  %v4069_v2 = vld [vmem:[#allocation11 + $0x1f8] sm:$0xf0]  ;;  %v4056_v3 = vor.u32 %v4678_v15, %v4053_v16 }
 0x19c   : > { %v1640_v28 = vadd.f32 %v1639_v17, %v1627_v19  ;;  %v4072_v10 = vor.u32 %v4682_v1, %v4069_v2  ;;  %v4132_v17 = vor.u32 %v4700_v11, %v4131_v9  ;;  %v3864_v19 = vor.u32 %v4630_v13, %v3861_v14  ;;  %v3989_v1 = vld [vmem:[#allocation11 + $0x158] sm:$0xf0]  ;;  %v4710_v2 = vld [vmem:[#allocation11 + $0x2cc] sm:$0xf]  ;;  %v4291_v9 = vld [vmem:[#allocation11 + $0x3a8] sm:$0xf] }
 0x19d   : > { %v4658_v11 = vld [vmem:[#allocation11 + $0x12c] sm:$0xf]  ;;  %v3973_v13 = vld [vmem:[#allocation11 + $0x138] sm:$0xf0] }
 0x19e   : > { %v1697_v33 = vmax.f32 %v1640_v28, 0.0  ;;  %v4706_v14 = vld [vmem:[#allocation11 + $0x2ac] sm:$0xf]  ;;  %v4165_v15 = vld [vmem:[#allocation11 + $0x2b8] sm:$0xf0] }
 0x19f   : > { %2592 = vmatpush.bf16.msrb.mxu0 %v3828_v20  ;;  %2601 = vmatpush.bf16.msrb.mxu1 %v4020_v21  ;;  %v4115_v20 = vld [vmem:[#allocation11 + $0x248] sm:$0xf] }
 0x1a0   : > { %v5434_v38 = vpack.c.bf16 %v1697_v33, %v1697_v33  ;;  %v4116_v29 = vor.u32 %v4696_v22, %v4115_v20  ;;  %v4040_v33 = vor.u32 %v4674_v26, %v4037_v27  ;;  %v4736_v20 = vld [vmem:[#allocation11 + $0x394] sm:$0xf0]  ;;  %v4702_v22 = vld [vmem:[#allocation11 + $0x28c] sm:$0xf]  ;;  %v4259_v27 = vld [vmem:[#allocation11 + $0x368] sm:$0xf] }
 0x1a1   : > { %v1628_v42 = vpop.f32.mrf.mxu2 }
 0x1a2   : > { %v1641_v43 = vpop.f32.mrf.mxu3  ;;  %2554 = vmatmul.bf16.vlgmr.msra.gmra.mxu1 %v5429_v12  ;;  %2593 = vmatmul.bf16.vlgmr.msrb.gmra.mxu0 %v5426_v62 }
 0x1a3   : > { %2637 = vmatpush.bf16.msra.mxu0 %v3944_v24  ;;  %2515 = vmatmul.bf16.vlgmr.msrb.gmra.mxu2 %v5434_v38  ;;  %v3845_v24 = vld [vmem:[#allocation11 + $0x38] sm:$0xf0]  ;;  %v4083_v43 = vld [vmem:[#allocation11 + $0x208] sm:$0xf] }
 0x1a4   : > { %2602 = vmatpush.bf16.msrb.mxu1 %v4004_v49  ;;  %2611 = vmatpush.bf16.msrb.mxu2 %v4196_v34  ;;  %v3848_v30 = vor.u32 %v4626_v23, %v3845_v24  ;;  %v4692_v49 = vld [vmem:[#allocation11 + $0x234] sm:$0xf0]  ;;  %v4622_v34 = vld [vmem:[#allocation11 + $0xc] sm:$0xf]  ;;  %v4149_v23 = vld [vmem:[#allocation11 + $0x298] sm:$0xf0] }
 0x1a5   : > { %v4100_v41 = vor.u32 %v4692_v49, %v4099_v31  ;;  %v4152_v26 = vor.u32 %v4702_v22, %v4149_v23  ;;  %v4728_v49 = vld [vmem:[#allocation11 + $0x354] sm:$0xf0] }
 0x1a6   : > { %v4752_v22 = vld [vmem:[#allocation13 + $0x18] sm:$0xff] }
 0x1a7   : > { %2638 = vmatpush.bf16.msra.mxu0 %v3928_v54  ;;  %v3829_v54 = vld [vmem:[#allocation11 + $0x18] sm:$0xf0] }
 0x1a8   : > { %2603 = vmatpush.bf16.msrb.mxu1 %v3988_v44  ;;  %2612 = vmatpush.bf16.msrb.mxu2 %v4180_v45  ;;  %v3832_v42 = vor.u32 %v4622_v34, %v3829_v54  ;;  %v4688_v44 = vld [vmem:[#allocation11 + $0x214] sm:$0xf0]  ;;  %v4694_v34 = vld [vmem:[#allocation11 + $0x24c] sm:$0xf]  ;;  %v4117_v54 = vld [vmem:[#allocation11 + $0x258] sm:$0xf0] }
 0x1a9   : > { %v4764_v23 = vld [vmem:[#allocation13 + $0x78] sm:$0xff] }
 0x1ab   : > { %2639 = vmatpush.bf16.msra.mxu0 %v3912_v46  ;;  %v4024_v46 = vor.u32 %v4670_v36, %v4021_v37  ;;  %v4120_v36 = vor.u32 %v4694_v34, %v4117_v54  ;;  %v4227_v37 = vld [vmem:[#allocation11 + $0x328] sm:$0xf]  ;;  %v4772_v34 = vld [vmem:[#allocation13 + $0xb8] sm:$0xff]  ;;  %v4759_v54 = vld [vmem:[#allocation13 + $0x50] sm:$0xff] }
 0x1ac   : > { %v1652_v0 = vpop.f32.mrf.mxu0  ;;  %2604 = vmatpush.bf16.msrb.mxu1 %v3972_v53  ;;  %2613 = vmatpush.bf16.msrb.mxu2 %v4164_v55  ;;  %v4084_v55 = vor.u32 %v4688_v44, %v4083_v43  ;;  %v4211_v44 = vld [vmem:[#allocation11 + $0x308] sm:$0xf] }
 0x1ad   : > { %v1653_v21 = vadd.f32 %v1652_v0, %v842_v6  ;;  %v4308_v6 = vor.u32 %v4744_v61, %v4307_v60  ;;  %v4734_v60 = vld [vmem:[#allocation11 + $0x38c] sm:$0xf]  ;;  %v4277_v61 = vld [vmem:[#allocation11 + $0x398] sm:$0xf0] }
 0x1af   : > { %v1665_v4 = vpop.f32.mrf.mxu1  ;;  %2640 = vmatpush.bf16.msra.mxu0 %v3896_v56  ;;  %v4324_v56 = vor.u32 %v4748_v47, %v4323_v18  ;;  %v4085_v18 = vld [vmem:[#allocation11 + $0x218] sm:$0xf0]  ;;  %v4746_v47 = vld [vmem:[#allocation11 + $0x3ec] sm:$0xf] }
 0x1b0   : > { %2605 = vmatpush.bf16.msrb.mxu1 %v3956_v5  ;;  %2614 = vmatpush.bf16.msrb.mxu2 %v4148_v7  ;;  %v1666_v32 = vadd.f32 %v1665_v4, %v1653_v21  ;;  %v4181_v4 = vld [vmem:[#allocation11 + $0x2d8] sm:$0xf0]  ;;  %v3992_v7 = vor.u32 %v4662_v63, %v3989_v1  ;;  %v4654_v21 = vld [vmem:[#allocation11 + $0x10c] sm:$0xf]  ;;  %v4328_v51 = vor.u32 %v4746_v47, %v4325_v48  ;;  %v4767_v47 = vld [vmem:[#allocation13 + $0x90] sm:$0xff] }
 0x1b1   : > { %v4280_v63 = vor.u32 %v4734_v60, %v4277_v61  ;;  %v4261_v1 = vld [vmem:[#allocation11 + $0x378] sm:$0xf0]  ;;  %v4765_v60 = vld [vmem:[#allocation13 + $0x80] sm:$0xff] }
 0x1b2   : > { %v4780_v61 = vld [vmem:[#allocation13 + $0xf8] sm:$0xff] }
 0x1b3   : > { %2641 = vmatpush.bf16.msra.mxu0 %v3880_v8  ;;  %2606 = vmatmul.bf16.vlgmr.msrb.gmra.mxu1 %v5429_v12  ;;  %v4184_v8 = vor.u32 %v4710_v2, %v4181_v4  ;;  %v4726_v4 = vld [vmem:[#allocation11 + $0x34c] sm:$0xf] }
 0x1b4   : > { %2650 = vmatpush.bf16.msra.mxu1 %v4072_v10  ;;  %v1654_v25 = vpop.f32.mrf.mxu0  ;;  %2567 = vmatmul.bf16.vlgmr.msra.gmra.mxu2 %v5434_v38  ;;  %v4740_v10 = vld [vmem:[#allocation11 + $0x3b4] sm:$0xf0] }
 0x1b5   : > { %2615 = vmatpush.bf16.msrb.mxu2 %v4132_v17  ;;  %v4292_v16 = vor.u32 %v4740_v10, %v4291_v9  ;;  %v4168_v17 = vor.u32 %v4706_v14, %v4165_v15  ;;  %v4718_v10 = vld [vmem:[#allocation11 + $0x30c] sm:$0xf]  ;;  %v4756_v15 = vld [vmem:[#allocation13 + $0x38] sm:$0xff] }
 0x1b7   : > { %v1667_v28 = vpop.f32.mrf.mxu1  ;;  %2642 = vmatpush.bf16.msra.mxu0 %v3864_v19  ;;  %v4275_v19 = vld [vmem:[#allocation11 + $0x388] sm:$0xf] }
 0x1b8   : > { %2651 = vmatpush.bf16.msra.mxu1 %v4056_v3  ;;  %v3957_v3 = vld [vmem:[#allocation11 + $0x118] sm:$0xf0]  ;;  %v4276_v24 = vor.u32 %v4736_v20, %v4275_v19  ;;  %v4732_v28 = vld [vmem:[#allocation11 + $0x374] sm:$0xf0]  ;;  %v4754_v19 = vld [vmem:[#allocation13 + $0x28] sm:$0xff] }
 0x1b9   : > { %v1678_v35 = vpop.f32.mrf.mxu2  ;;  %2616 = vmatpush.bf16.msrb.mxu2 %v4116_v29  ;;  %v3960_v25 = vor.u32 %v4654_v21, %v3957_v3  ;;  %v4698_v29 = vld [vmem:[#allocation11 + $0x26c] sm:$0xf]  ;;  %v4260_v31 = vor.u32 %v4732_v28, %v4259_v27  ;;  %v4753_v20 = vld [vmem:[#allocation13 + $0x20] sm:$0xff] }
 0x1ba   : > { %v1679_v39 = vadd.f32 %v1678_v35, %v1666_v32  ;;  %v1691_v40 = vpop.f32.mrf.mxu3  ;;  %v4750_v27 = vld [vmem:[#allocation13 + $0x8] sm:$0xff] }
 0x1bb   : > { %2643 = vmatpush.bf16.msra.mxu0 %v3848_v30  ;;  %v4133_v30 = vld [vmem:[#allocation11 + $0x278] sm:$0xf0]  ;;  %v4762_v28 = vld [vmem:[#allocation13 + $0x68] sm:$0xff] }
 0x1bc   : > { %v1692_v45 = vadd.f32 %v1691_v40, %v1679_v39  ;;  %2652 = vmatpush.bf16.msra.mxu1 %v4040_v33  ;;  %v4136_v32 = vor.u32 %v4698_v29, %v4133_v30  ;;  %v4243_v33 = vld [vmem:[#allocation11 + $0x348] sm:$0xf]  ;;  %v4724_v39 = vld [vmem:[#allocation11 + $0x334] sm:$0xf0]  ;;  %v4690_v40 = vld [vmem:[#allocation11 + $0x22c] sm:$0xf] }
 0x1bd   : > { %2617 = vmatpush.bf16.msrb.mxu2 %v4100_v41  ;;  %v4244_v35 = vor.u32 %v4728_v49, %v4243_v33  ;;  %v4101_v41 = vld [vmem:[#allocation11 + $0x238] sm:$0xf0]  ;;  %v4749_v29 = vld [vmem:[#allocation13] sm:$0xff] }
 0x1be   : > { %v1698_v53 = vmax.f32 %v1692_v45, 0.0  ;;  %v4104_v43 = vor.u32 %v4690_v40, %v4101_v41  ;;  %v4720_v45 = vld [vmem:[#allocation11 + $0x314] sm:$0xf0]  ;;  %v4761_v30 = vld [vmem:[#allocation13 + $0x60] sm:$0xff]  ;;  %v4770_v40 = vld [vmem:[#allocation13 + $0xa8] sm:$0xff] }
 0x1bf   : > { %2644 = vmatpush.bf16.msra.mxu0 %v3832_v42  ;;  %v4228_v42 = vor.u32 %v4724_v39, %v4227_v37  ;;  %v4212_v50 = vor.u32 %v4720_v45, %v4211_v44  ;;  %v4760_v49 = vld [vmem:[#allocation13 + $0x58] sm:$0xff]  ;;  %v4758_v39 = vld [vmem:[#allocation13 + $0x48] sm:$0xff]  ;;  %v4757_v41 = vld [vmem:[#allocation13 + $0x40] sm:$0xff] }
 0x1c0   : > { %v5442_v57 = vpack.c.bf16 %v1698_v53, %v1698_v53  ;;  %2653 = vmatpush.bf16.msra.mxu1 %v4024_v46  ;;  %v4686_v46 = vld [vmem:[#allocation11 + $0x20c] sm:$0xf]  ;;  %v4309_v53 = vld [vmem:[#allocation11 + $0x3d8] sm:$0xf0] }
 0x1c1   : > { %v1680_v0 = vpop.f32.mrf.mxu2  ;;  %2618 = vmatpush.bf16.msrb.mxu2 %v4084_v55  ;;  %v4312_v55 = vor.u32 %v4742_v52, %v4309_v53  ;;  %v4766_v53 = vld [vmem:[#allocation13 + $0x88] sm:$0xff] }
 0x1c2   : > { %v1693_v5 = vpop.f32.mrf.mxu3  ;;  %2528 = vmatmul.bf16.vlgmr.msrb.gmra.mxu3 %v5442_v57  ;;  %2645 = vmatmul.bf16.vlgmr.msra.gmra.mxu0 %v5426_v62  ;;  %v3976_v62 = vor.u32 %v4658_v11, %v3973_v13  ;;  %v4730_v0 = vld [vmem:[#allocation11 + $0x36c] sm:$0xf] }
 0x1c3   : > { %2624 = vmatpush.bf16.msrb.mxu3 %v4324_v56  ;;  %v4738_v56 = vld [vmem:[#allocation11 + $0x3ac] sm:$0xf]  ;;  %v4264_v2 = vor.u32 %v4730_v0, %v4261_v1  ;;  %v4245_v5 = vld [vmem:[#allocation11 + $0x358] sm:$0xf0]  ;;  %2957 = vmatpush.bf16.msrb.mxu0 %v4756_v15 }
 0x1c4   : > { %2654 = vmatpush.bf16.msra.mxu1 %v4008_v58  ;;  %2619 = vmatmul.bf16.vlgmr.msrb.gmra.mxu2 %v5434_v38  ;;  %v4293_v58 = vld [vmem:[#allocation11 + $0x3b8] sm:$0xf0] }
 0x1c5   : > { %2663 = vmatpush.bf16.msra.mxu2 %v4200_v59  ;;  %v4296_v59 = vor.u32 %v4738_v56, %v4293_v58 }
 0x1c7   : > { %2625 = vmatpush.bf16.msrb.mxu3 %v4308_v6  ;;  %v4248_v6 = vor.u32 %v4726_v4, %v4245_v5  ;;  %v4778_v5 = vld [vmem:[#allocation13 + $0xe8] sm:$0xff] }
 0x1c8   : > { %2655 = vmatpush.bf16.msra.mxu1 %v3992_v7  ;;  %v4722_v7 = vld [vmem:[#allocation11 + $0x32c] sm:$0xf] }
 0x1c9   : > { %2664 = vmatpush.bf16.msra.mxu2 %v4184_v8  ;;  %v4229_v8 = vld [vmem:[#allocation11 + $0x338] sm:$0xf0] }
 0x1ca   : > { %v4232_v9 = vor.u32 %v4722_v7, %v4229_v8 }
 0x1cb   : > { %2626 = vmatpush.bf16.msrb.mxu3 %v4292_v16  ;;  %v4755_v16 = vld [vmem:[#allocation13 + $0x30] sm:$0xff] }
 0x1cc   : > { %2656 = vmatpush.bf16.msra.mxu1 %v3976_v62  ;;  %2958 = vmatpush.bf16.msrb.mxu0 %v4755_v16 }
 0x1cd   : > { %2665 = vmatpush.bf16.msra.mxu2 %v4168_v17 }
 0x1cf   : > { %2627 = vmatpush.bf16.msrb.mxu3 %v4276_v24  ;;  %v4763_v24 = vld [vmem:[#allocation13 + $0x70] sm:$0xff] }
 0x1d0   : > { %2657 = vmatpush.bf16.msra.mxu1 %v3960_v25  ;;  %2959 = vmatpush.bf16.msrb.mxu0 %v4754_v19  ;;  %v4775_v19 = vld [vmem:[#allocation13 + $0xd0] sm:$0xff] }
 0x1d1   : > { %2666 = vmatpush.bf16.msra.mxu2 %v4152_v26 }
 0x1d2   : > { %2580 = vmatmul.bf16.vlgmr.msra.gmra.mxu3 %v5442_v57 }
 0x1d3   : > { %2628 = vmatpush.bf16.msrb.mxu3 %v4260_v31  ;;  %2658 = vmatmul.bf16.vlgmr.msra.gmra.mxu1 %v5429_v12  ;;  %v4088_v12 = vor.u32 %v4686_v46, %v4085_v18  ;;  %v4768_v18 = vld [vmem:[#allocation13 + $0x98] sm:$0xff] }
 0x1d4   : > { %2960 = vmatpush.bf16.msrb.mxu0 %v4753_v20  ;;  %2970 = vmatpush.bf16.msrb.mxu1 %v4764_v23 }
 0x1d5   : > { %2667 = vmatpush.bf16.msra.mxu2 %v4136_v32 }
 0x1d7   : > { %2629 = vmatpush.bf16.msrb.mxu3 %v4244_v35  ;;  %v4771_v35 = vld [vmem:[#allocation13 + $0xb0] sm:$0xff] }
 0x1d8   : > { %2961 = vmatpush.bf16.msrb.mxu0 %v4752_v22  ;;  %2971 = vmatpush.bf16.msrb.mxu1 %v4763_v24 }
 0x1d9   : > { %2668 = vmatpush.bf16.msra.mxu2 %v4120_v36 }
 0x1db   : > { %2630 = vmatpush.bf16.msrb.mxu3 %v4228_v42  ;;  %v4769_v42 = vld [vmem:[#allocation13 + $0xa0] sm:$0xff] }
 0x1dc   : > { %2972 = vmatpush.bf16.msrb.mxu1 %v4762_v28 }
 0x1dd   : > { %2669 = vmatpush.bf16.msra.mxu2 %v4104_v43  ;;  %v5463_v43 = vld [vmem:[%s5517_s6] sm:$0xf] }
 0x1de   : > { %v1833_v46 = vperm.slane %v5463_v43, 0  ;;  %v1834_v1 = vperm.slane %v5463_v43, 1  ;;  %v1835_v20 = vperm.slane %v5463_v43, 2 }
 0x1df   : > { %2631 = vmatpush.bf16.msrb.mxu3 %v4212_v50 }
 0x1e0   : > { %2973 = vmatpush.bf16.msrb.mxu1 %v4761_v30 }
 0x1e1   : > { %2670 = vmatpush.bf16.msra.mxu2 %v4088_v12 }
 0x1e2   : > { %2632 = vmatmul.bf16.vlgmr.msrb.gmra.mxu3 %v5442_v57 }
 0x1e3   : > { %2676 = vmatpush.bf16.msra.mxu3 %v4328_v51 }
 0x1e4   : > { %2671 = vmatmul.bf16.vlgmr.msra.gmra.mxu2 %v5434_v38  ;;  %v4213_v38 = vld [vmem:[#allocation11 + $0x318] sm:$0xf0]  ;;  %2974 = vmatpush.bf16.msrb.mxu1 %v4760_v49 }
 0x1e5   : > { %v4216_v11 = vor.u32 %v4718_v10, %v4213_v38  ;;  %2983 = vmatpush.bf16.msrb.mxu2 %v4772_v34  ;;  %v4777_v10 = vld [vmem:[#allocation13 + $0xe0] sm:$0xff] }
 0x1e7   : > { %2677 = vmatpush.bf16.msra.mxu3 %v4312_v55 }
 0x1e8   : > { %2975 = vmatpush.bf16.msrb.mxu1 %v4759_v54 }
 0x1e9   : > { %2984 = vmatpush.bf16.msrb.mxu2 %v4771_v35 }
 0x1eb   : > { %2678 = vmatpush.bf16.msra.mxu3 %v4296_v59 }
 0x1ec   : > { %2976 = vmatpush.bf16.msrb.mxu1 %v4758_v39 }
 0x1ed   : > { %2985 = vmatpush.bf16.msrb.mxu2 %v4770_v40 }
 0x1ef   : > { %2679 = vmatpush.bf16.msra.mxu3 %v4280_v63 }
 0x1f0   : > { %2977 = vmatpush.bf16.msrb.mxu1 %v4757_v41 }
 0x1f1   : > { %2986 = vmatpush.bf16.msrb.mxu2 %v4769_v42 }
 0x1f3   : > { %2680 = vmatpush.bf16.msra.mxu3 %v4264_v2  ;;  %v4779_v2 = vld [vmem:[#allocation13 + $0xf0] sm:$0xff] }
 0x1f5   : > { %2987 = vmatpush.bf16.msrb.mxu2 %v4768_v18 }
 0x1f7   : > { %2681 = vmatpush.bf16.msra.mxu3 %v4248_v6 }
 0x1f9   : > { %2988 = vmatpush.bf16.msrb.mxu2 %v4767_v47 }
 0x1fb   : > { %2682 = vmatpush.bf16.msra.mxu3 %v4232_v9 }
 0x1fd   : > { %2989 = vmatpush.bf16.msrb.mxu2 %v4766_v53 }
 0x1ff   : > { %2683 = vmatpush.bf16.msra.mxu3 %v4216_v11  ;;  %v2490_v13 = vpop.f32.mrf.mxu0 }
 0x200   : > { %v2491_v50 = vadd.f32 %v2490_v13, %v1833_v46 }
 0x201   : > { %2990 = vmatpush.bf16.msrb.mxu2 %v4765_v60 }
 0x202   : > { %2684 = vmatmul.bf16.vlgmr.msra.gmra.mxu3 %v5442_v57  ;;  %v4751_v57 = vld [vmem:[#allocation13 + $0x10] sm:$0xff] }
 0x203   : > { %2962 = vmatpush.bf16.msrb.mxu0 %v4751_v57  ;;  %2996 = vmatpush.bf16.msrb.mxu3 %v4780_v61  ;;  %v4773_v57 = vld [vmem:[#allocation13 + $0xc0] sm:$0xff] }
 0x207   : > { %v2492_v14 = vpop.f32.mrf.mxu0  ;;  %2963 = vmatpush.bf16.msrb.mxu0 %v4750_v27  ;;  %2997 = vmatpush.bf16.msrb.mxu3 %v4779_v2 }
 0x208   : > { %v4776_v14 = vld [vmem:[#allocation13 + $0xd8] sm:$0xff] }
 0x20b   : > { %2964 = vmatpush.bf16.msrb.mxu0 %v4749_v29  ;;  %2998 = vmatpush.bf16.msrb.mxu3 %v4778_v5 }
 0x20f   : > { %v2503_v62 = vpop.f32.mrf.mxu1  ;;  %v5452_v17 = vpop.f32.mrf.mxu0  ;;  %2999 = vmatpush.bf16.msrb.mxu3 %v4777_v10 }
 0x210   : > { %v2504_v51 = vadd.f32 %v2503_v62, %v2491_v50  ;;  %v2543_v6 = vadd.f32 %v5452_v17, %v1834_v1 }
 0x213   : > { %3000 = vmatpush.bf16.msrb.mxu3 %v4776_v14 }
 0x217   : > { %v2505_v21 = vpop.f32.mrf.mxu1  ;;  %v2544_v3 = vpop.f32.mrf.mxu0  ;;  %3001 = vmatpush.bf16.msrb.mxu3 %v4775_v19 }
 0x218   : > { %v4774_v3 = vld [vmem:[#allocation13 + $0xc8] sm:$0xff] }
 0x21b   : > { %3002 = vmatpush.bf16.msrb.mxu3 %v4774_v3 }
 0x21f   : > { %v5454_v25 = vpop.f32.mrf.mxu1  ;;  %v5456_v26 = vpop.f32.mrf.mxu0  ;;  %3003 = vmatpush.bf16.msrb.mxu3 %v4773_v57 }
 0x220   : > { %v2556_v9 = vadd.f32 %v5454_v25, %v2543_v6  ;;  %v2595_v21 = vadd.f32 %v5456_v26, %v1835_v20 }
 0x226   : > { %v2516_v31 = vpop.f32.mrf.mxu2 }
 0x227   : > { %v2557_v32 = vpop.f32.mrf.mxu1  ;;  %v2596_v33 = vpop.f32.mrf.mxu0  ;;  %v2517_v52 = vadd.f32 %v2516_v31, %v2504_v51 }
 0x228   : > { %v1836_v32 = vperm.slane %v5463_v43, 3  ;;  %v4892_v43 = vld [vmem:[%s5519_s8] ss:$0 sm:$0xff] }
 0x22e   : > { %v2518_v36 = vpop.f32.mrf.mxu2 }
 0x230   : > { %v5458_v37 = vpop.f32.mrf.mxu1 }
 0x231   : > { %v2608_v22 = vadd.f32 %v5458_v37, %v2595_v21 }
 0x237   : > { %v2568_v44 = vpop.f32.mrf.mxu2 }
 0x238   : > { %v2609_v45 = vpop.f32.mrf.mxu1  ;;  %v2569_v38 = vadd.f32 %v2568_v44, %v2556_v9 }
 0x23f   : > { %v2646_v48 = vpop.f32.mrf.mxu0  ;;  %v2570_v12 = vpop.f32.mrf.mxu2 }
 0x240   : > { %v2647_v33 = vadd.f32 %v2646_v48, %v1836_v32 }
 0x245   : > { %v2529_v55 = vpop.f32.mrf.mxu3 }
 0x246   : > { %v2530_v56 = vadd.f32 %v2529_v55, %v2517_v52 }
 0x247   : > { %v2648_v58 = vpop.f32.mrf.mxu0  ;;  %v2620_v63 = vpop.f32.mrf.mxu2 }
 0x248   : > { %v2689_v59 = vmax.f32 %v2530_v56, 0.0  ;;  %v2621_v23 = vadd.f32 %v2620_v63, %v2608_v22 }
 0x24a   : > { %v2693_v0 = vpack.c.bf16 %v2689_v59, %v2689_v59 }
 0x24c   : > { %2965 = vmatmul.bf16.vlgmr.msrb.gmra.mxu0 %v2693_v0 }
 0x24d   : > { %v2531_v4 = vpop.f32.mrf.mxu3 }
 0x24f   : > { %v2622_v8 = vpop.f32.mrf.mxu2 }
 0x250   : > { %v2659_v7 = vpop.f32.mrf.mxu1 }
 0x251   : > { %v2660_v49 = vadd.f32 %v2659_v7, %v2647_v33 }
 0x255   : > { %v2581_v11 = vpop.f32.mrf.mxu3 }
 0x256   : > { %v2582_v13 = vadd.f32 %v2581_v11, %v2569_v38 }
 0x258   : > { %v2690_v15 = vmax.f32 %v2582_v13, 0.0  ;;  %v2661_v16 = vpop.f32.mrf.mxu1 }
 0x25a   : > { %v2694_v62 = vpack.c.bf16 %v2690_v15, %v2690_v15 }
 0x25c   : > { %2978 = vmatmul.bf16.vlgmr.msrb.gmra.mxu1 %v2694_v62 }
 0x25d   : > { %v2583_v17 = vpop.f32.mrf.mxu3 }
 0x265   : > { %v2633_v24 = vpop.f32.mrf.mxu3 }
 0x266   : > { %v2634_v25 = vadd.f32 %v2633_v24, %v2621_v23 }
 0x267   : > { %v2672_v27 = vpop.f32.mrf.mxu2 }
 0x268   : > { %v2691_v28 = vmax.f32 %v2634_v25, 0.0  ;;  %v2673_v26 = vadd.f32 %v2672_v27, %v2660_v49 }
 0x26a   : > { %v2695_v29 = vpack.c.bf16 %v2691_v28, %v2691_v28 }
 0x26c   : > { %2991 = vmatmul.bf16.vlgmr.msrb.gmra.mxu2 %v2695_v29 }
 0x26d   : > { %v2635_v30 = vpop.f32.mrf.mxu3 }
 0x26f   : > { %v2674_v31 = vpop.f32.mrf.mxu2 }
 0x285   : > { %v2685_v34 = vpop.f32.mrf.mxu3 }
 0x286   : > { %v2686_v54 = vadd.f32 %v2685_v34, %v2673_v26 }
 0x288   : > { %v2692_v35 = vmax.f32 %v2686_v54, 0.0 }
 0x28a   : > { %v2696_v36 = vpack.c.bf16 %v2692_v35, %v2692_v35 }
 0x28c   : > { %3004 = vmatmul.bf16.vlgmr.msrb.gmra.mxu3 %v2696_v36 }
 0x28d   : > { %v2687_v37 = vpop.f32.mrf.mxu3 }
 0x2c9   : > { %v2966_v39 = vpop.f32.mrf.mxu0 }
 0x2ca   : > { %v2967_v46 = vadd.f32 %v4892_v43, %v2966_v39 }
 0x2d1   : > { %v2968_v40 = vpop.f32.mrf.mxu0 }
 0x2d9   : > { %v2979_v41 = vpop.f32.mrf.mxu1 }
 0x2da   : > { %v2980_v18 = vadd.f32 %v2979_v41, %v2967_v46 }
 0x2e1   : > { %v2981_v42 = vpop.f32.mrf.mxu1 }
 0x2ef   : > { %v2992_v44 = vpop.f32.mrf.mxu2 }
 0x2f0   : > { %v2993_v47 = vadd.f32 %v2992_v44, %v2980_v18 }
 0x2f7   : > { %v2994_v45 = vpop.f32.mrf.mxu2 }
 0x30f   : > { %v3005_v48 = vpop.f32.mrf.mxu3 }
 0x310   : > { %v3006_v50 = vadd.f32 %v3005_v48, %v2993_v47 }
 0x312   : > { %v3009_v12 = vand.u32 2147483647, %v3006_v50 }
 0x314   : > { %v3010_v51 = vadd.f32 1.0, %v3009_v12 }
 0x316   : > { %4893 = vrcp.f32 %v3010_v51 }
 0x317   : > { %v3007_v52 = vpop.f32.mrf.mxu3 }
 0x31c   : > { %v4894_v53 = vpop.eup %4893 }
 0x31d   : > { %v3012_v55 = vmul.f32 %v4894_v53, %v3006_v50 }
 0x31f   : > { %3013 = vst [vmem:[%s444_s1] sm:$0xff] %v3012_v55 }
 0x320   : > { %5132 = shalt.err (!%p5129_p9)
}
 0x321   : > { %4807 = dma.vmem_to_hbm [thread:$0]  (%p5342_p4), %s3028_s26, 128, %s3030_s3, %s3015_s27  }
 0x322 PF: > { %s3041_s15 = sand.u32 1, %s5171_s30   ;;  %p5536_p10 = scmp.ge.s32.totalorder %s5183_s12, 2 }
 0x323   : > { %s3042_s14 = scalar_lea.sflag [#allocation4], %s3041_s15 }
 0x324   : > { %p4833_p13 = pnand %p5536_p10, %p5346_p6 }
 0x326   : > { %p4834_p11 = pneg %p4833_p13 }
 0x328   : > { %5166 = dma.done.wait (%p4834_p11), %s3042_s14, 128  }
 0x329   : > { %5168 = vsyncadd (%p4834_p11), %s3042_s14, 4294967168  ;;  %p25_p0 = scmp.ge.s32.totalorder %s5316_s20, 4   ;;  %s5537_s30 = smov %s5175_s10 }
 0x32a   : > { %s5538_s10 = smov %s5179_s11  ;;  %s5539_s11 = smov %s5327_s25 }
 0x32b   : > { %s5540_s12 = smov %s5316_s20  ;;  %27 = sbr.rel (!%p25_p0) target bundleno = 13 (0xd), region = 125 }
 0x330   :  { %3048 = vsyncpa [#allocation3], 1 }
 0x331   :  { %3050 = vsyncpa [#allocation3 + $0x1], 1 }
 0x332   :  { %3051 = vsyncpa [#allocation6], 1 }
 0x333   :  { %3052 = vsyncpa [#allocation9], 1 }
 0x334   :  { %3053 = vsyncpa [#allocation12], 1 }
 0x335   :  { %3054 = vsyncpa [#allocation4], 1 }
 0x336   :  { %3056 = vsyncpa [#allocation4 + $0x1], 1 }

</bundles_post_ra>
